<compile_context>
chip_gen: v7x
topology: tpu7x:2x2x1
jax: 0.10.0
libtpu: 0.0.40
codegen_flags: <defaults>
</compile_context>

<pallas_src>
import functools

import jax
import jax.numpy as jnp
import numpy as np
from jax.experimental import pallas as pl
from jax.experimental.pallas import tpu as pltpu


def _round_up(x, m):
    return (x + m - 1) // m * m


def _conv2d_kernel(x_ref, w_ref, b_ref, o_ref, *,
                   kh, kw, stride, dilation, th, wout, se):
    """Grid = (batch, h_tile).

    x_ref: (1, Hp_tot, Wp, Cin_p)  spatially pre-padded input (resident per batch)
    w_ref: (KH, KW, Cin_p, Cout_p) weights (resident across the whole grid)
    b_ref: (1, Cout_p)             bias (f32)
    o_ref: (1, TH, Wout, Cout_p)   output row-tile
    """
    t = pl.program_id(1)
    cin = w_ref.shape[2]
    cout = w_ref.shape[3]

    # First input row needed by this output row-tile.
    row0 = pl.multiple_of(t * (th * stride), th * stride)

    def ds(start, size, s):
        # Stride-aware dynamic slice; plain ds when stride == 1.
        return pl.ds(start, size) if s == 1 else pl.ds(start, size, s)

    # Initialise the accumulator with the broadcast bias (saves a VPU pass).
    acc = jnp.broadcast_to(b_ref[...], (th * wout, cout)).astype(jnp.float32)

    # Direct convolution: one full-depth (K = Cin_p, a 128-multiple) MXU matmul per
    # kernel tap, accumulating in f32.
    for i in range(kh):
        for j in range(kw):
            patch = x_ref[0,
                          ds(row0 + i * dilation, th, stride),
                          ds(j * dilation, wout, stride),
                          :]                                    # (th, wout, cin)
            acc = acc + jnp.dot(patch.reshape(th * wout, cin),
                                w_ref[i, j],
                                preferred_element_type=jnp.float32)

    if se == 'relu':
        acc = jnp.maximum(acc, 0.0)
    elif se == 'sigmoid':
        acc = jax.nn.sigmoid(acc)
    # else: identity (module sets self.relu = None)

    o_ref[0] = acc.reshape(th, wout, cout).astype(o_ref.dtype)


def conv2d_module(x_nchw, w_oihw, bias, *, stride=1, dilation=1,
                  bn=False, bn_params=None, se='relu', pad=True):
    """Forward pass of the `Conv2d` module. Inputs/weights in PyTorch layout.

    bn=True is supported only in inference form: pass bn_params =
    dict(gamma, beta, mean, var, eps); the affine is folded into the conv
    weights/bias before the kernel runs.
    """
    if bn:
        if bn_params is None:
            # TODO(synk): BatchNorm2d with on-the-fly *batch* statistics (training
            # mode) is not implemented; only folded inference-mode BN is supported.
            raise NotImplementedError(
                "Conv2d(bn=True) requires bn_params for inference-mode folding")
        gamma = bn_params["gamma"].astype(jnp.float32)
        beta = bn_params["beta"].astype(jnp.float32)
        mean = bn_params["mean"].astype(jnp.float32)
        var = bn_params["var"].astype(jnp.float32)
        eps = float(bn_params.get("eps", 1e-5))
        scale = gamma / jnp.sqrt(var + eps)                    # (Cout,)
        w_oihw = w_oihw * scale[:, None, None, None]
        bias = (bias.astype(jnp.float32) - mean) * scale + beta

    n, cin, h, w = x_nchw.shape
    cout, cin_w, kh, kw = w_oihw.shape
    assert cin == cin_w

    # Same padding formula as the PyTorch module (exact match, incl. even k).
    padding = int(dilation * (kh - 1) / 2) if pad else 0

    hp = h + 2 * padding
    wp = w + 2 * padding
    hout = (hp - dilation * (kh - 1) - 1) // stride + 1
    wout = (wp - dilation * (kw - 1) - 1) // stride + 1

    LANE = 128
    cin_p = _round_up(cin, LANE)
    cout_p = _round_up(cout, LANE)

    # Output-row tile: pick TH so the MXU M-dimension (TH * Wout) is ~128
    # (matches the MXU tile and keeps the f32 accumulator small), while still
    # giving the pipeline / both v7x TensorCores enough grid steps.
    th = max(1, min(hout, max(1, 128 // max(1, wout))))
    th = min(th, 64)
    hout_p = -(-hout // th) * th                       # round Hout up to tile
    # Input rows needed to produce hout_p output rows (avoids any OOB reads).
    hp_need = (hout_p - 1) * stride + dilation * (kh - 1) + 1
    extra_h = max(0, hp_need - hp)
    hp_tot = hp + extra_h

    # NCHW -> NHWC, spatial pad (+ bottom rows for the H-tile round-up),
    # lane-dense channel pad, bf16 cast.
    x = jnp.transpose(x_nchw, (0, 2, 3, 1)).astype(jnp.bfloat16)
    x = jnp.pad(x, ((0, 0),
                    (padding, padding + extra_h),
                    (padding, padding),
                    (0, cin_p - cin)))

    w_hwio = jnp.transpose(w_oihw, (2, 3, 1, 0)).astype(jnp.bfloat16)
    w_hwio = jnp.pad(w_hwio, ((0, 0), (0, 0),
                              (0, cin_p - cin), (0, cout_p - cout)))
    b2 = jnp.pad(bias.astype(jnp.float32), (0, cout_p - cout)).reshape(1, cout_p)

    out_dtype = x_nchw.dtype
    out_itemsize = jnp.dtype(out_dtype).itemsize

    kernel = functools.partial(
        _conv2d_kernel, kh=kh, kw=kw, stride=stride, dilation=dilation,
        th=th, wout=wout, se=se)

    # Per-step VMEM working set estimate (inputs/weights/outputs double-buffered).
    vmem_needed = (2 * hp_tot * wp * cin_p * 2
                   + 2 * kh * kw * cin_p * cout_p * 2
                   + 2 * th * wout * cout_p * out_itemsize
                   + 2 * cout_p * 4)
    cp_kwargs = dict(dimension_semantics=("parallel", "parallel"))
    if vmem_needed > 24 * 1024 * 1024:
        # Raise the scoped-VMEM limit for large shapes, but stay below v7x's
        # 64 MiB physical VMEM per TensorCore.
        cp_kwargs["vmem_limit_bytes"] = int(min(vmem_needed * 3 // 2,
                                                60 * 1024 * 1024))

    out_nhwc = pl.pallas_call(
        kernel,
        out_shape=jax.ShapeDtypeStruct((n, hout_p, wout, cout_p), out_dtype),
        grid_spec=pltpu.PrefetchScalarGridSpec(
            num_scalar_prefetch=0,
            grid=(n, hout_p // th),
            in_specs=[
                # Full padded image per batch; constant across the inner h-tile
                # axis => kept VMEM-resident, not re-DMAed per row tile.
                pl.BlockSpec((1, hp_tot, wp, cin_p), lambda b, t: (b, 0, 0, 0)),
                # Weights / bias: constant index => resident across the grid.
                pl.BlockSpec((kh, kw, cin_p, cout_p), lambda b, t: (0, 0, 0, 0)),
                pl.BlockSpec((1, cout_p), lambda b, t: (0, 0)),
            ],
            out_specs=pl.BlockSpec((1, th, wout, cout_p),
                                   lambda b, t: (b, t, 0, 0)),
        ),
        compiler_params=pltpu.CompilerParams(**cp_kwargs),
    )(x, w_hwio, b2)

    # Strip Hout / Cout padding, NHWC -> NCHW to match PyTorch output layout.
    out_nhwc = out_nhwc[:, :hout, :, :cout]
    return jnp.transpose(out_nhwc, (0, 3, 1, 2))


if __name__ == "__main__":
    # Small shapes consistent with the module: N=2, Cin=4, H=W=16, Cout=8, k=3.
    key = jax.random.PRNGKey(0)
    kx, kw_, kb = jax.random.split(key, 3)

    N, Cin, H, W = 2, 4, 16, 16
    Cout, K = 8, 3

    x = jax.random.normal(kx, (N, Cin, H, W), dtype=jnp.float32)
    weight = jax.random.normal(kw_, (Cout, Cin, K, K), dtype=jnp.float32) * 0.1
    bias = jax.random.normal(kb, (Cout,), dtype=jnp.float32) * 0.1

    out = conv2d_module(x, weight, bias, stride=1, dilation=1,
                        bn=False, se='relu', pad=True)
    out = jax.block_until_ready(out)

    # Pure-JAX reference (same bf16 input/weight rounding, f32 accumulation).
    x_bf = x.astype(jnp.bfloat16).astype(jnp.float32)
    w_bf = weight.astype(jnp.bfloat16).astype(jnp.float32)
    ref = jax.lax.conv_general_dilated(
        x_bf, w_bf, window_strides=(1, 1),
        padding=[(1, 1), (1, 1)], rhs_dilation=(1, 1),
        dimension_numbers=('NCHW', 'OIHW', 'NCHW'))
    ref = jnp.maximum(ref + bias[None, :, None, None], 0.0)

    assert out.shape == (N, Cout, H, W), out.shape
    np.testing.assert_allclose(np.asarray(out), np.asarray(ref),
                               rtol=5e-3, atol=5e-3)
    print("KERNEL_OK")
</pallas_src>

<mosaic_0001>
module attributes {stable_mosaic.version = 11 : i64} {
  func.func @_conv2d_kernel(%arg0: i32, %arg1: i32, %arg2: memref<1x18x18x128xbf16, #tpu.memory_space<vmem>>, %arg3: memref<3x3x128x128xbf16, #tpu.memory_space<vmem>>, %arg4: memref<1x128xf32, #tpu.memory_space<vmem>>, %arg5: memref<1x8x16x128xf32, #tpu.memory_space<vmem>>) attributes {dimension_semantics = [#tpu.dimension_semantics<parallel>, #tpu.dimension_semantics<parallel>], iteration_bounds = array<i64: 2, 2>, scalar_prefetch = 0 : i64, scratch_operands = 0 : i64, tpu.core_type = #tpu.core_type<tc>, window_params = [{transform_indices = @transform_0, window_bounds = array<i64: 1, 18, 18, 128>}, {pipeline_mode = #tpu.pipeline_mode<synchronous>, transform_indices = @transform_1, window_bounds = array<i64: 3, 3, 128, 128>}, {pipeline_mode = #tpu.pipeline_mode<synchronous>, transform_indices = @transform_2, window_bounds = array<i64: 1, 128>}, {transform_indices = @transform_3, window_bounds = array<i64: 1, 8, 16, 128>}]} {
    %c8_i32 = arith.constant 8 : i32
    %0 = arith.muli %arg1, %c8_i32 : i32
    %1 = tpu.assume_multiple %0, 8 : i32
    %c0 = arith.constant 0 : index
    %c0_0 = arith.constant 0 : index
    %2 = vector.load %arg4[%c0, %c0_0] : memref<1x128xf32, #tpu.memory_space<vmem>>, vector<1x128xf32>
    %3 = vector.shape_cast %2 : vector<1x128xf32> to vector<1x128xf32>
    %4 = vector.broadcast %3 : vector<1x128xf32> to vector<128x128xf32>
    %c0_i32 = arith.constant 0 : i32
    %5 = arith.addi %1, %c0_i32 : i32
    %c0_1 = arith.constant 0 : index
    %6 = arith.index_cast %5 : i32 to index
    %c0_2 = arith.constant 0 : index
    %c0_3 = arith.constant 0 : index
    %7 = vector.load %arg2[%c0_1, %6, %c0_2, %c0_3] : memref<1x18x18x128xbf16, #tpu.memory_space<vmem>>, vector<1x8x16x128xbf16>
    %8 = vector.shape_cast %7 : vector<1x8x16x128xbf16> to vector<8x16x128xbf16>
    %9 = vector.shape_cast %8 : vector<8x16x128xbf16> to vector<128x128xbf16>
    %c0_4 = arith.constant 0 : index
    %c0_5 = arith.constant 0 : index
    %c0_6 = arith.constant 0 : index
    %c0_7 = arith.constant 0 : index
    %10 = vector.load %arg3[%c0_4, %c0_5, %c0_6, %c0_7] : memref<3x3x128x128xbf16, #tpu.memory_space<vmem>>, vector<1x1x128x128xbf16>
    %11 = vector.shape_cast %10 : vector<1x1x128x128xbf16> to vector<128x128xbf16>
    %cst = arith.constant dense<0.000000e+00> : vector<128x128xf32>
    %12 = tpu.matmul %9, %11, %cst {dimension_numbers = #tpu.dot_dimension_numbers<[1], [0], [0], [1], [0, 0, 1, 1], [], []>} : vector<128x128xbf16>, vector<128x128xbf16>, vector<128x128xf32> -> vector<128x128xf32>
    %13 = arith.addf %4, %12 : vector<128x128xf32>
    %c0_i32_8 = arith.constant 0 : i32
    %14 = arith.addi %1, %c0_i32_8 : i32
    %c0_9 = arith.constant 0 : index
    %15 = arith.index_cast %14 : i32 to index
    %c1 = arith.constant 1 : index
    %c0_10 = arith.constant 0 : index
    %16 = vector.load %arg2[%c0_9, %15, %c1, %c0_10] : memref<1x18x18x128xbf16, #tpu.memory_space<vmem>>, vector<1x8x16x128xbf16>
    %17 = vector.shape_cast %16 : vector<1x8x16x128xbf16> to vector<8x16x128xbf16>
    %18 = vector.shape_cast %17 : vector<8x16x128xbf16> to vector<128x128xbf16>
    %c0_11 = arith.constant 0 : index
    %c1_12 = arith.constant 1 : index
    %c0_13 = arith.constant 0 : index
    %c0_14 = arith.constant 0 : index
    %19 = vector.load %arg3[%c0_11, %c1_12, %c0_13, %c0_14] : memref<3x3x128x128xbf16, #tpu.memory_space<vmem>>, vector<1x1x128x128xbf16>
    %20 = vector.shape_cast %19 : vector<1x1x128x128xbf16> to vector<128x128xbf16>
    %cst_15 = arith.constant dense<0.000000e+00> : vector<128x128xf32>
    %21 = tpu.matmul %18, %20, %cst_15 {dimension_numbers = #tpu.dot_dimension_numbers<[1], [0], [0], [1], [0, 0, 1, 1], [], []>} : vector<128x128xbf16>, vector<128x128xbf16>, vector<128x128xf32> -> vector<128x128xf32>
    %22 = arith.addf %13, %21 : vector<128x128xf32>
    %c0_i32_16 = arith.constant 0 : i32
    %23 = arith.addi %1, %c0_i32_16 : i32
    %c0_17 = arith.constant 0 : index
    %24 = arith.index_cast %23 : i32 to index
    %c2 = arith.constant 2 : index
    %c0_18 = arith.constant 0 : index
    %25 = vector.load %arg2[%c0_17, %24, %c2, %c0_18] : memref<1x18x18x128xbf16, #tpu.memory_space<vmem>>, vector<1x8x16x128xbf16>
    %26 = vector.shape_cast %25 : vector<1x8x16x128xbf16> to vector<8x16x128xbf16>
    %27 = vector.shape_cast %26 : vector<8x16x128xbf16> to vector<128x128xbf16>
    %c0_19 = arith.constant 0 : index
    %c2_20 = arith.constant 2 : index
    %c0_21 = arith.constant 0 : index
    %c0_22 = arith.constant 0 : index
    %28 = vector.load %arg3[%c0_19, %c2_20, %c0_21, %c0_22] : memref<3x3x128x128xbf16, #tpu.memory_space<vmem>>, vector<1x1x128x128xbf16>
    %29 = vector.shape_cast %28 : vector<1x1x128x128xbf16> to vector<128x128xbf16>
    %cst_23 = arith.constant dense<0.000000e+00> : vector<128x128xf32>
    %30 = tpu.matmul %27, %29, %cst_23 {dimension_numbers = #tpu.dot_dimension_numbers<[1], [0], [0], [1], [0, 0, 1, 1], [], []>} : vector<128x128xbf16>, vector<128x128xbf16>, vector<128x128xf32> -> vector<128x128xf32>
    %31 = arith.addf %22, %30 : vector<128x128xf32>
    %c1_i32 = arith.constant 1 : i32
    %32 = arith.addi %1, %c1_i32 : i32
    %c0_24 = arith.constant 0 : index
    %33 = arith.index_cast %32 : i32 to index
    %c0_25 = arith.constant 0 : index
    %c0_26 = arith.constant 0 : index
    %34 = vector.load %arg2[%c0_24, %33, %c0_25, %c0_26] : memref<1x18x18x128xbf16, #tpu.memory_space<vmem>>, vector<1x8x16x128xbf16>
    %35 = vector.shape_cast %34 : vector<1x8x16x128xbf16> to vector<8x16x128xbf16>
    %36 = vector.shape_cast %35 : vector<8x16x128xbf16> to vector<128x128xbf16>
    %c1_27 = arith.constant 1 : index
    %c0_28 = arith.constant 0 : index
    %c0_29 = arith.constant 0 : index
    %c0_30 = arith.constant 0 : index
    %37 = vector.load %arg3[%c1_27, %c0_28, %c0_29, %c0_30] : memref<3x3x128x128xbf16, #tpu.memory_space<vmem>>, vector<1x1x128x128xbf16>
    %38 = vector.shape_cast %37 : vector<1x1x128x128xbf16> to vector<128x128xbf16>
    %cst_31 = arith.constant dense<0.000000e+00> : vector<128x128xf32>
    %39 = tpu.matmul %36, %38, %cst_31 {dimension_numbers = #tpu.dot_dimension_numbers<[1], [0], [0], [1], [0, 0, 1, 1], [], []>} : vector<128x128xbf16>, vector<128x128xbf16>, vector<128x128xf32> -> vector<128x128xf32>
    %40 = arith.addf %31, %39 : vector<128x128xf32>
    %c1_i32_32 = arith.constant 1 : i32
    %41 = arith.addi %1, %c1_i32_32 : i32
    %c0_33 = arith.constant 0 : index
    %42 = arith.index_cast %41 : i32 to index
    %c1_34 = arith.constant 1 : index
    %c0_35 = arith.constant 0 : index
    %43 = vector.load %arg2[%c0_33, %42, %c1_34, %c0_35] : memref<1x18x18x128xbf16, #tpu.memory_space<vmem>>, vector<1x8x16x128xbf16>
    %44 = vector.shape_cast %43 : vector<1x8x16x128xbf16> to vector<8x16x128xbf16>
    %45 = vector.shape_cast %44 : vector<8x16x128xbf16> to vector<128x128xbf16>
    %c1_36 = arith.constant 1 : index
    %c1_37 = arith.constant 1 : index
    %c0_38 = arith.constant 0 : index
    %c0_39 = arith.constant 0 : index
    %46 = vector.load %arg3[%c1_36, %c1_37, %c0_38, %c0_39] : memref<3x3x128x128xbf16, #tpu.memory_space<vmem>>, vector<1x1x128x128xbf16>
    %47 = vector.shape_cast %46 : vector<1x1x128x128xbf16> to vector<128x128xbf16>
    %cst_40 = arith.constant dense<0.000000e+00> : vector<128x128xf32>
    %48 = tpu.matmul %45, %47, %cst_40 {dimension_numbers = #tpu.dot_dimension_numbers<[1], [0], [0], [1], [0, 0, 1, 1], [], []>} : vector<128x128xbf16>, vector<128x128xbf16>, vector<128x128xf32> -> vector<128x128xf32>
    %49 = arith.addf %40, %48 : vector<128x128xf32>
    %c1_i32_41 = arith.constant 1 : i32
    %50 = arith.addi %1, %c1_i32_41 : i32
    %c0_42 = arith.constant 0 : index
    %51 = arith.index_cast %50 : i32 to index
    %c2_43 = arith.constant 2 : index
    %c0_44 = arith.constant 0 : index
    %52 = vector.load %arg2[%c0_42, %51, %c2_43, %c0_44] : memref<1x18x18x128xbf16, #tpu.memory_space<vmem>>, vector<1x8x16x128xbf16>
    %53 = vector.shape_cast %52 : vector<1x8x16x128xbf16> to vector<8x16x128xbf16>
    %54 = vector.shape_cast %53 : vector<8x16x128xbf16> to vector<128x128xbf16>
    %c1_45 = arith.constant 1 : index
    %c2_46 = arith.constant 2 : index
    %c0_47 = arith.constant 0 : index
    %c0_48 = arith.constant 0 : index
    %55 = vector.load %arg3[%c1_45, %c2_46, %c0_47, %c0_48] : memref<3x3x128x128xbf16, #tpu.memory_space<vmem>>, vector<1x1x128x128xbf16>
    %56 = vector.shape_cast %55 : vector<1x1x128x128xbf16> to vector<128x128xbf16>
    %cst_49 = arith.constant dense<0.000000e+00> : vector<128x128xf32>
    %57 = tpu.matmul %54, %56, %cst_49 {dimension_numbers = #tpu.dot_dimension_numbers<[1], [0], [0], [1], [0, 0, 1, 1], [], []>} : vector<128x128xbf16>, vector<128x128xbf16>, vector<128x128xf32> -> vector<128x128xf32>
    %58 = arith.addf %49, %57 : vector<128x128xf32>
    %c2_i32 = arith.constant 2 : i32
    %59 = arith.addi %1, %c2_i32 : i32
    %c0_50 = arith.constant 0 : index
    %60 = arith.index_cast %59 : i32 to index
    %c0_51 = arith.constant 0 : index
    %c0_52 = arith.constant 0 : index
    %61 = vector.load %arg2[%c0_50, %60, %c0_51, %c0_52] : memref<1x18x18x128xbf16, #tpu.memory_space<vmem>>, vector<1x8x16x128xbf16>
    %62 = vector.shape_cast %61 : vector<1x8x16x128xbf16> to vector<8x16x128xbf16>
    %63 = vector.shape_cast %62 : vector<8x16x128xbf16> to vector<128x128xbf16>
    %c2_53 = arith.constant 2 : index
    %c0_54 = arith.constant 0 : index
    %c0_55 = arith.constant 0 : index
    %c0_56 = arith.constant 0 : index
    %64 = vector.load %arg3[%c2_53, %c0_54, %c0_55, %c0_56] : memref<3x3x128x128xbf16, #tpu.memory_space<vmem>>, vector<1x1x128x128xbf16>
    %65 = vector.shape_cast %64 : vector<1x1x128x128xbf16> to vector<128x128xbf16>
    %cst_57 = arith.constant dense<0.000000e+00> : vector<128x128xf32>
    %66 = tpu.matmul %63, %65, %cst_57 {dimension_numbers = #tpu.dot_dimension_numbers<[1], [0], [0], [1], [0, 0, 1, 1], [], []>} : vector<128x128xbf16>, vector<128x128xbf16>, vector<128x128xf32> -> vector<128x128xf32>
    %67 = arith.addf %58, %66 : vector<128x128xf32>
    %c2_i32_58 = arith.constant 2 : i32
    %68 = arith.addi %1, %c2_i32_58 : i32
    %c0_59 = arith.constant 0 : index
    %69 = arith.index_cast %68 : i32 to index
    %c1_60 = arith.constant 1 : index
    %c0_61 = arith.constant 0 : index
    %70 = vector.load %arg2[%c0_59, %69, %c1_60, %c0_61] : memref<1x18x18x128xbf16, #tpu.memory_space<vmem>>, vector<1x8x16x128xbf16>
    %71 = vector.shape_cast %70 : vector<1x8x16x128xbf16> to vector<8x16x128xbf16>
    %72 = vector.shape_cast %71 : vector<8x16x128xbf16> to vector<128x128xbf16>
    %c2_62 = arith.constant 2 : index
    %c1_63 = arith.constant 1 : index
    %c0_64 = arith.constant 0 : index
    %c0_65 = arith.constant 0 : index
    %73 = vector.load %arg3[%c2_62, %c1_63, %c0_64, %c0_65] : memref<3x3x128x128xbf16, #tpu.memory_space<vmem>>, vector<1x1x128x128xbf16>
    %74 = vector.shape_cast %73 : vector<1x1x128x128xbf16> to vector<128x128xbf16>
    %cst_66 = arith.constant dense<0.000000e+00> : vector<128x128xf32>
    %75 = tpu.matmul %72, %74, %cst_66 {dimension_numbers = #tpu.dot_dimension_numbers<[1], [0], [0], [1], [0, 0, 1, 1], [], []>} : vector<128x128xbf16>, vector<128x128xbf16>, vector<128x128xf32> -> vector<128x128xf32>
    %76 = arith.addf %67, %75 : vector<128x128xf32>
    %c2_i32_67 = arith.constant 2 : i32
    %77 = arith.addi %1, %c2_i32_67 : i32
    %c0_68 = arith.constant 0 : index
    %78 = arith.index_cast %77 : i32 to index
    %c2_69 = arith.constant 2 : index
    %c0_70 = arith.constant 0 : index
    %79 = vector.load %arg2[%c0_68, %78, %c2_69, %c0_70] : memref<1x18x18x128xbf16, #tpu.memory_space<vmem>>, vector<1x8x16x128xbf16>
    %80 = vector.shape_cast %79 : vector<1x8x16x128xbf16> to vector<8x16x128xbf16>
    %81 = vector.shape_cast %80 : vector<8x16x128xbf16> to vector<128x128xbf16>
    %c2_71 = arith.constant 2 : index
    %c2_72 = arith.constant 2 : index
    %c0_73 = arith.constant 0 : index
    %c0_74 = arith.constant 0 : index
    %82 = vector.load %arg3[%c2_71, %c2_72, %c0_73, %c0_74] : memref<3x3x128x128xbf16, #tpu.memory_space<vmem>>, vector<1x1x128x128xbf16>
    %83 = vector.shape_cast %82 : vector<1x1x128x128xbf16> to vector<128x128xbf16>
    %cst_75 = arith.constant dense<0.000000e+00> : vector<128x128xf32>
    %84 = tpu.matmul %81, %83, %cst_75 {dimension_numbers = #tpu.dot_dimension_numbers<[1], [0], [0], [1], [0, 0, 1, 1], [], []>} : vector<128x128xbf16>, vector<128x128xbf16>, vector<128x128xf32> -> vector<128x128xf32>
    %85 = arith.addf %76, %84 : vector<128x128xf32>
    %cst_76 = arith.constant 0.000000e+00 : f32
    %86 = vector.broadcast %cst_76 : f32 to vector<128x128xf32>
    %87 = arith.maximumf %85, %86 : vector<128x128xf32>
    %88 = vector.shape_cast %87 : vector<128x128xf32> to vector<8x16x128xf32>
    %c0_77 = arith.constant 0 : index
    %c0_78 = arith.constant 0 : index
    %c0_79 = arith.constant 0 : index
    %c0_80 = arith.constant 0 : index
    %89 = vector.load %arg5[%c0_77, %c0_78, %c0_79, %c0_80] : memref<1x8x16x128xf32, #tpu.memory_space<vmem>>, vector<1x8x16x128xf32>
    %90 = vector.shape_cast %89 : vector<1x8x16x128xf32> to vector<8x16x128xf32>
    %91 = vector.shape_cast %88 : vector<8x16x128xf32> to vector<1x8x16x128xf32>
    tpu.vector_store %arg5[%c0_77, %c0_78, %c0_79, %c0_80], %91 {strides = array<i32>} : memref<1x8x16x128xf32, #tpu.memory_space<vmem>>, vector<1x8x16x128xf32>,
    return
  }
  func.func @transform_0(%arg0: i32, %arg1: i32) -> (i32, i32, i32, i32) {
    %c0_i32 = arith.constant 0 : i32
    %c0_i32_0 = arith.constant 0 : i32
    %c0_i32_1 = arith.constant 0 : i32
    %c0_i32_2 = arith.constant 0 : i32
    return %arg0, %c0_i32, %c0_i32_0, %c0_i32_1 : i32, i32, i32, i32
  }
  func.func @transform_1(%arg0: i32, %arg1: i32) -> (i32, i32, i32, i32) {
    %c0_i32 = arith.constant 0 : i32
    %c0_i32_0 = arith.constant 0 : i32
    %c0_i32_1 = arith.constant 0 : i32
    %c0_i32_2 = arith.constant 0 : i32
    %c0_i32_3 = arith.constant 0 : i32
    return %c0_i32, %c0_i32_0, %c0_i32_1, %c0_i32_2 : i32, i32, i32, i32
  }
  func.func @transform_2(%arg0: i32, %arg1: i32) -> (i32, i32) {
    %c0_i32 = arith.constant 0 : i32
    %c0_i32_0 = arith.constant 0 : i32
    %c0_i32_1 = arith.constant 0 : i32
    return %c0_i32, %c0_i32_0 : i32, i32
  }
  func.func @transform_3(%arg0: i32, %arg1: i32) -> (i32, i32, i32, i32) {
    %c0_i32 = arith.constant 0 : i32
    %c0_i32_0 = arith.constant 0 : i32
    %c0_i32_1 = arith.constant 0 : i32
    return %arg0, %arg1, %c0_i32, %c0_i32_0 : i32, i32, i32, i32
  }
}

</mosaic_0001>

<bundles_post_ra>
// kernel: tpu_custom_call.1
= control target key start
LH: loop header
LB: loop body
LE: loop exit
PB: predicated region body
PF: predicated region fallthrough
CT: control target
= control target key end

     0   :  { %8 = vsyncpa [#allocation3], 0  ;;  %s5530_s0 = inlined_call_operand.vmem [shape: bf16[2,18,18,128], index: 0, kind: input, shape index: {}]   ;;  %s5531_s1 = inlined_call_operand.vmem [shape: bf16[3,3,128,128], index: 1, kind: input, shape index: {}]   ;;  %s5532_s2 = inlined_call_operand.vmem [shape: f32[1,128], index: 2, kind: input, shape index: {}]   ;;  %s5533_s3 = inlined_call_operand.hbm [shape: f32[2,16,16,128], index: 3, kind: output, shape index: {}]  }
   0x1   :  { %10 = vsyncpa [#allocation3 + $0x1], 0  ;;  %s4539_s12 = smov 0   ;;  %s4541_s13 = smov 0  }
   0x2   :  { %s4543_s14 = smov 0   ;;  %s4545_s15 = smov 0  }
   0x3   :  { %s4547_s16 = smov 0   ;;  %s4549_s17 = smov 0  }
   0x4   :  { %s4551_s18 = smov 0   ;;  %s4553_s19 = smov 0  }
   0x5 LB: > { %s3242_s20 = sadd.s32 4294967295, %s4514_s19   ;;  %s3243_s21 = sadd.s32 4294967294, %s4514_s19   ;;  %s4514_s19 = sphi %s4553_s19, %s16_s19   ;;  %s4510_s18 = sphi %s4551_s18, %s5546_s18   ;;  %s4506_s17 = sphi %s4549_s17, %s5545_s17   ;;  %s4502_s16 = sphi %s4547_s16, %s5544_s16   ;;  %s4498_s15 = sphi %s4545_s15, %s5543_s15   ;;  %s4494_s14 = sphi %s4543_s14, %s5542_s14   ;;  %s4490_s13 = sphi %s4541_s13, %s5541_s13   ;;  %s4486_s12 = sphi %s4539_s12, %s5540_s12  }
   0x6   : > { %s25_s22 = sadd.s32 1, %s4506_s17  ;;  %s28_s23 = sadd.s32 1, %s4510_s18 }
   0x7   : > { %p26_p0 = scmp.ge.s32.totalorder %s25_s22, 2  ;;  %p115_p1 = scmp.ne.s32.totalorder %s4494_s14, %s4490_s13 }
   0x8   : > { %p116_p2 = scmp.eq.s32.totalorder %s3242_s20, 3  ;;  %p121_p5 = scmp.ne.s32.totalorder %s4490_s13, %s4486_s12 }
   0x9   : > { %s5548_s22 = smov (%p26_p0, %s25_s22), 0  ;;  %s5550_s23 = smov (!%p26_p0, %s28_s23), %s4510_s18 }
   0xa   : > { %s101_s24 = ssub.s32 %s4506_s17, %s5548_s22  ;;  %p4590_p3 = por %p116_p2, %p115_p1 }
   0xb   : > { %p30_p4 = scmp.ge.s32.totalorder %s5550_s23, 2  ;;  %p122_p6 = scmp.eq.s32.totalorder %s3243_s21, 3 }
   0xc   : > { %p3246_p7 = scmp.ge.s32.totalorder %s4514_s19, 1  ;;  %p154_p9 = scmp.lt.s32.totalorder %s4514_s19, 5 }
   0xd   : > { %s5552_s23 = smov (%p30_p4, %s5550_s23), 0  ;;  %p4599_p8 = por %p122_p6, %p121_p5 }
   0xe   : > { %s100_s27 = ssub.s32 %s4510_s18, %s5552_s23  ;;  %s105_s28 = sadd.s32 1, %s4494_s14 }
   0xf   : > { %s102_s29 = sor.u32 %s101_s24, %s100_s27  ;;  %p155_p10 = pnand %p3246_p7, %p154_p9 }
  0x10   : > { %p103_p11 = scmp.eq.s32.totalorder %s102_s29, 0  ;;  %v4324_v0 = vld [vmem:[%s5531_s1] sm:$0xff] (!%p155_p10)   ;;  %p178_p12 = scmp.lt.s32.totalorder (!%p155_p10), %s4502_s16, 1  ;;  %v4326_v2 = vld [vmem:[%s5531_s1 + $0x8] sm:$0xff] (!%p155_p10)   ;;  %v4328_v4 = vld [vmem:[%s5531_s1 + $0x10] sm:$0xff] (!%p155_p10)   ;;  %vm898_vm3 = vcmask (!%p155_p10), 1042432  }
  0x11   : > { %158 = sbr.rel (%p155_p10) target bundleno = 438 (0x1b6), region = 32  ;;  %v4325_v1 = vld [vmem:[%s5531_s1 + $0x100] sm:$0xff] (!%p155_p10)   ;;  %3802 = vmatprep.subr.bf16.mxu1 (!%p155_p10), %v4324_v0  ;;  %v4327_v3 = vld [vmem:[%s5531_s1 + $0x108] sm:$0xff] (!%p155_p10)   ;;  %v4329_v5 = vld [vmem:[%s5531_s1 + $0x110] sm:$0xff] (!%p155_p10)   ;;  %vm461_vm0 = vsmask.f32 (!%p155_p10), 3328 }
  0x12   : > { %s4608_s30 = scalar_select %p103_p11, %s4494_s14, %s105_s28  }
  0x13   : > { %3930 = vmatprep.subr.bf16.mxu0 (!%p155_p10), %v4325_v1  ;;  %3803 = vmatpush3.bf16.msra.mxu1 (!%p155_p10), %v4324_v0  ;;  %v4330_v6 = vld [vmem:[%s5531_s1 + $0x18] sm:$0xff] (!%p155_p10)   ;;  %s3656_s8 = smul.u32 (!%p155_p10), 96, %s4498_s15  ;;  %v4332_v8 = vld [vmem:[%s5531_s1 + $0x20] sm:$0xff] (!%p155_p10)   ;;  %v4334_v10 = vld [vmem:[%s5531_s1 + $0x28] sm:$0xff] (!%p155_p10)   ;;  %vm462_vm1 = vsmask.f32 (!%p155_p10), 7440 }
  0x14   : > { %3931 = vmatpush3.bf16.msra.mxu0 (!%p155_p10), %v4325_v1  ;;  %3804 = vmatprep.subr.bf16.mxu1 (!%p155_p10), %v4326_v2  ;;  %v4331_v7 = vld [vmem:[%s5531_s1 + $0x118] sm:$0xff] (!%p155_p10)   ;;  %v4333_v9 = vld [vmem:[%s5531_s1 + $0x120] sm:$0xff] (!%p155_p10)   ;;  %v4335_v12 = vld [vmem:[%s5531_s1 + $0x128] sm:$0xff] (!%p155_p10)   ;;  %vm899_vm4 = vcmask (!%p155_p10), 1046532   ;;  %s3657_s24 = sshll.u32 (!%p155_p10), %s4498_s15, 4  ;;  %s3652_s27 = sshll.u32 (!%p155_p10), %s4502_s16, 5 }
  0x15   : > { %3932 = vmatprep.subr.bf16.mxu0 (!%p155_p10), %v4327_v3  ;;  %v4336_v18 = vld [vmem:[%s5531_s1 + $0x30] sm:$0xff] (!%p155_p10)   ;;  %v4338_v28 = vld [vmem:[%s5531_s1 + $0x38] sm:$0xff] (!%p155_p10)   ;;  %vm4682_vm2 = vmor (!%p155_p10), %vm461_vm0, %vm462_vm1  ;;  %s3153_s15 = sadd.s32 (!%p155_p10), %s3657_s24, %s3652_s27  ;;  %s4516_s9 = smov (!%p155_p10), [#allocation2]  }
  0x16   : > { %v4337_v24 = vld [vmem:[%s5531_s1 + $0x130] sm:$0xff] (!%p155_p10)   ;;  %v4339_v32 = vld [vmem:[%s5531_s1 + $0x138] sm:$0xff] (!%p155_p10)   ;;  %v4342_v49 = vld [vmem:[%s5531_s1 + $0x40] sm:$0xff] (!%p155_p10)  }
  0x17   : > { %3805 = vmatpush3.bf16.msra.mxu1 (!%p155_p10), %v4326_v2  ;;  %v4343_v55 = vld [vmem:[%s5531_s1 + $0x140] sm:$0xff] (!%p155_p10)   ;;  %v4344_v0 = vld [vmem:[%s5531_s1 + $0x48] sm:$0xff] (!%p155_p10)   ;;  %vm4835_vm5 = vmor (!%p155_p10), %vm898_vm3, %vm899_vm4 }
  0x18   : > { %s179_s20 = scalar_select %p178_p12, %s4502_s16, 1  ;;  %3933 = vmatpush3.bf16.msra.mxu0 %v4327_v3  ;;  %3806 = vmatprep.subr.bf16.mxu1 %v4328_v4 }
  0x19   : > { %3934 = vmatprep.subr.bf16.mxu0 %v4329_v5  ;;  %s3653_s16 = sshll.u32 %s3153_s15, 7 }
  0x1a   : > { %s4250_s29 = smul.u32 216, %s179_s20  ;;  %s5469_s6 = scalar_lea.hbm %s5533_s3, %s3653_s16 }
  0x1b   : > { %3807 = vmatpush3.bf16.msra.mxu1 %v4328_v4 }
  0x1c   : > { %s182_s11 = scalar_lea.vmem %s5530_s0, %s4250_s29  ;;  %3935 = vmatpush3.bf16.msra.mxu0 %v4329_v5  ;;  %3808 = vmatprep.subr.bf16.mxu1 %v4330_v6 }
  0x1d   : > { %3936 = vmatprep.subr.bf16.mxu0 %v4331_v7  ;;  %s4646_s28 = scalar_lea.vmem %s182_s11, %s3656_s8  ;;  %s175_s11 = sand.u32 1, %s4490_s13  }
  0x1e   : > { %v4340_v11 = vld [vmem:[%s4646_s28] sm:$0xff]   ;;  %v3391_v13 = vld [vmem:[%s4646_s28 + $0xc] sm:$0xf]  ;;  %v4657_v14 = vld [vmem:[%s4646_s28 + $0x10] sm:$0xf]  ;;  %s3247_s20 = sshll.u32 %s175_s11, 7 }
  0x1f   : > { %3809 = vmatpush3.bf16.msra.mxu1 %v4330_v6  ;;  %3818 = vmatprep.mubr.bf16.mxu1 %v4340_v11  ;;  %v4660_v15 = vld [vmem:[%s4646_s28 + $0x14] sm:$0x1]  ;;  %v1438_v16 = vshrl.u32 %v3391_v13, 16  ;;  %v1441_v17 = vshll.u32 %v3391_v13, 16  ;;  %v1447_v19 = vshll.u32 %v4657_v14, 16  ;;  %v1451_v20 = vshrl.u32 %v4657_v14, 16 }
  0x20   : > { %3937 = vmatpush3.bf16.msra.mxu0 %v4331_v7  ;;  %3810 = vmatprep.subr.bf16.mxu1 %v4332_v8  ;;  %v1457_v21 = vshll.u32 %v4660_v15, 16  ;;  %v3394_v30 = vld [vmem:[%s4646_s28 + $0x18] sm:$0xf]  ;;  %v4676_v31 = vld [vmem:[%s4646_s28 + $0x1c] sm:$0xf]  ;;  %v1876_v48 = vrot.slane %v4660_v15, 5 }
  0x21   : > { %3938 = vmatprep.subr.bf16.mxu0 %v4333_v9  ;;  %v1440_v22 = vrot.slane %v1438_v16, 4  ;;  %v1443_v23 = vrot.slane %v1441_v17, 5  ;;  %v1449_v25 = vrot.slane %v1447_v19, 5  ;;  %v1453_v26 = vrot.slane %v1451_v20, 4  ;;  %v4687_v35 = vld [vmem:[%s4646_s28 + $0x20] sm:$0x1] }
  0x22   : > { %v1459_v27 = vrot.slane %v1457_v21, 5  ;;  %v1462_v36 = vshrl.u32 %v3394_v30, 16  ;;  %v1465_v37 = vshll.u32 %v3394_v30, 16  ;;  %v1471_v38 = vshll.u32 %v4676_v31, 16  ;;  %v4341_v57 = vld [vmem:[%s4646_s28 + $0xc] sm:$0xff]   ;;  %s5439_s21 = scalar_lea.vmem [#allocation2], %s3247_s20 }
  0x23   : > { %3811 = vmatpush3.bf16.msra.mxu1 %v4332_v8  ;;  %v1444_v29 = vor.u32 %v1443_v23, %v1440_v22  ;;  %v1454_v34 = vor.u32 %v1453_v26, %v1449_v25  ;;  %v1475_v40 = vshrl.u32 %v4676_v31, 16  ;;  %v1481_v41 = vshll.u32 %v4687_v35, 16  ;;  %v3397_v61 = vld [vmem:[%s4646_s28 + $0x24] sm:$0xf]  ;;  %v4712_v62 = vld [vmem:[%s4646_s28 + $0x28] sm:$0xf] }
  0x24   : > { %3939 = vmatpush3.bf16.msra.mxu0 %v4333_v9  ;;  %3812 = vmatprep.subr.bf16.mxu1 %v4334_v10  ;;  %v1880_v42 = vrot.slane %v4676_v31, 5  ;;  %v1464_v44 = vrot.slane %v1462_v36, 4  ;;  %v1467_v45 = vrot.slane %v1465_v37, 5  ;;  %v1473_v46 = vrot.slane %v1471_v38, 5  ;;  %v4718_v1 = vld [vmem:[%s4646_s28 + $0x2c] sm:$0x1] }
  0x25   : > { %3940 = vmatprep.subr.bf16.mxu0 %v4335_v12  ;;  %v1445_v39 = vrot.slane %v1444_v29, 4  ;;  %v1455_v43 = vrot.slane %v1454_v34, 4  ;;  %v1477_v50 = vrot.slane %v1475_v40, 4  ;;  %v1483_v53 = vrot.slane %v1481_v41, 5  ;;  %v4345_v6 = vld [vmem:[%s5531_s1 + $0x148] sm:$0xff]   ;;  %v4348_v26 = vld [vmem:[%s5531_s1 + $0x50] sm:$0xff]  }
  0x26   : > { %v1468_v52 = vor.u32 %v1467_v45, %v1464_v44  ;;  %v4703_v54 = vrot.slane %v1880_v42, 4  ;;  %v1883_v60 = vrot.slane %v4687_v35, 5  ;;  %v1486_v2 = vshrl.u32 %v3397_v61, 16  ;;  %v3400_v19 = vld [vmem:[%s4646_s28 + $0x30] sm:$0xf]  ;;  %v4350_v45 = vld [vmem:[%s5531_s1 + $0x58] sm:$0xff]  }
  0x27   : > { %3813 = vmatpush3.bf16.msra.mxu1 %v4334_v10  ;;  %v1450_v47 = vsel %vm4682_vm2, %v1445_v39, %v1449_v25  ;;  %v1460_v51 = vsel %vm4682_vm2, %v1455_v43, %v1459_v27  ;;  %v1478_v58 = vor.u32 %v1477_v50, %v1473_v46  ;;  %v1489_v3 = vshll.u32 %v3397_v61, 16  ;;  %v4346_v10 = vld [vmem:[%s4646_s28 + $0x18] sm:$0xff]   ;;  %v4733_v21 = vld [vmem:[%s4646_s28 + $0x34] sm:$0xf]  ;;  %v3449_v31 = vld [vmem:[%s4646_s28 + $0x24] sm:$0xe] }
  0x28   : > { %3941 = vmatpush3.bf16.msra.mxu0 %v4335_v12  ;;  %3814 = vmatprep.subr.bf16.mxu1 %v4336_v18  ;;  %v3431_v56 = vcombine.low %v1450_v47, %v1460_v51  ;;  %v1469_v59 = vrot.slane %v1468_v52, 4  ;;  %v1495_v4 = vshll.u32 %v4712_v62, 16  ;;  %v1499_v7 = vshrl.u32 %v4712_v62, 16  ;;  %v4736_v22 = vld [vmem:[%s4646_s28 + $0x38] sm:$0x1]  ;;  %v4349_v37 = vld [vmem:[%s5531_s1 + $0x150] sm:$0xff]  }
  0x29   : > { %3942 = vmatprep.subr.bf16.mxu0 %v4337_v24  ;;  %v1479_v63 = vrot.slane %v1478_v58, 4  ;;  %v1505_v8 = vshll.u32 %v4718_v1, 16  ;;  %v1488_v11 = vrot.slane %v1486_v2, 4  ;;  %v1491_v12 = vrot.slane %v1489_v3, 5  ;;  %v4765_v58 = vld [vmem:[%s4646_s28 + $0x44] sm:$0x1] }
  0x2a   : > { %3946 = vmatprep.mubr.bf16.mxu0 %v3431_v56  ;;  %v1474_v5 = vsel %vm4682_vm2, %v1469_v59, %v1473_v46  ;;  %v1497_v13 = vrot.slane %v1495_v4, 5  ;;  %v1501_v17 = vrot.slane %v1499_v7, 4  ;;  %v1510_v23 = vshrl.u32 %v3400_v19, 16  ;;  %v4762_v56 = vld [vmem:[%s4646_s28 + $0x40] sm:$0xf]  ;;  %s3156_s4 = sshll.u32 %s5439_s21, 4  ;;  %s5471_s4 = int_to_ptr.vmem [resolvable:$true] %s3156_s4 }
  0x2b   : > { %3815 = vmatpush3.bf16.msra.mxu1 %v4336_v18  ;;  %v1484_v9 = vsel %vm4682_vm2, %v1479_v63, %v1483_v53  ;;  %v1507_v18 = vrot.slane %v1505_v8, 5  ;;  %v1492_v20 = vor.u32 %v1491_v12, %v1488_v11  ;;  %v1519_v27 = vshll.u32 %v4733_v21, 16  ;;  %v4352_v53 = vld [vmem:[%s4646_s28 + $0x30] sm:$0xff]   ;;  %v4353_v11 = vld [vmem:[%s4646_s28 + $0x3c] sm:$0xff]   ;;  %s5478_s7 = scalar_lea.sflag [#allocation3], %s175_s11  ;;  %s4420_s8 = scalar_lea.vmem %s5471_s4, 2048 }
  0x2c   : > { %3943 = vmatpush3.bf16.msra.mxu0 %v4337_v24  ;;  %3816 = vmatprep.subr.bf16.mxu1 %v4338_v28  ;;  %v3432_v16 = vcombine.low %v1474_v5, %v1484_v9  ;;  %v1513_v24 = vshll.u32 %v3400_v19, 16  ;;  %v1502_v25 = vor.u32 %v1501_v17, %v1497_v13  ;;  %v1529_v29 = vshll.u32 %v4736_v22, 16  ;;  %v4354_v12 = vld [vmem:[%s5531_s1 + $0x60] sm:$0xff]   ;;  %v3406_v17 = vld [vmem:[%s4646_s28 + $0x48] sm:$0xf]  ;;  %p4421_p13 = scmp.ne.s32.totalorder %s5471_s4, %s4420_s8 }
  0x2d   : > { %3944 = vmatprep.subr.bf16.mxu0 %v4339_v32  ;;  %v1493_v30 = vrot.slane %v1492_v20, 4  ;;  %v1512_v34 = vrot.slane %v1510_v23, 4  ;;  %v1521_v39 = vrot.slane %v1519_v27, 5  ;;  %v1873_v50 = vrot.slane %v4657_v14, 5  ;;  %v4786_v19 = vld [vmem:[%s4646_s28 + $0x50] sm:$0x1] }
  0x2e   : > { %v1515_v36 = vrot.slane %v1513_v24, 5  ;;  %v1503_v38 = vrot.slane %v1502_v25, 4  ;;  %v1531_v41 = vrot.slane %v1529_v29, 5  ;;  %v1543_v63 = vshll.u32 %v4762_v56, 16  ;;  %p4422_p0 = pnand %p4421_p13, %p4590_p3 }
  0x2f   : > { %3817 = vmatpush3.bf16.msra.mxu1 %v4338_v28  ;;  %v1523_v28 = vshrl.u32 %v4733_v21, 16  ;;  %v1498_v43 = vsel %vm4682_vm2, %v1493_v30, %v1497_v13  ;;  %v1547_v2 = vshrl.u32 %v4762_v56, 16  ;;  %v1553_v3 = vshll.u32 %v4765_v58, 16  ;;  %v4355_v13 = vld [vmem:[%s5531_s1 + $0x160] sm:$0xff]   ;;  %v4357_v30 = vld [vmem:[%s5531_s1 + $0x168] sm:$0xff]  }
  0x30   : > { %3945 = vmatpush3.bf16.msra.mxu0 %v4339_v32  ;;  %3834 = vmatprep.subr.bf16.mxu1 %v4342_v49  ;;  %v4347_v32 = vld [vmem:[%s4646_s28 + $0x24] sm:$0xff]   ;;  %v1516_v44 = vor.u32 %v1515_v36, %v1512_v34  ;;  %v1508_v46 = vsel %vm4682_vm2, %v1503_v38, %v1507_v18  ;;  %v1545_v7 = vrot.slane %v1543_v63, 5  ;;  %v4783_v18 = vld [vmem:[%s4646_s28 + $0x4c] sm:$0xf]  ;;  %v1558_v23 = vshrl.u32 %v3406_v17, 16  ;;  %p4423_p1 = pneg %p4422_p0 }
  0x31   : > { %3962 = vmatprep.subr.bf16.mxu0 %v4343_v55  ;;  %v1525_v40 = vrot.slane %v1523_v28, 4  ;;  %v3433_v51 = vcombine.low %v1498_v43, %v1508_v46  ;;  %v1549_v9 = vrot.slane %v1547_v2, 4  ;;  %v1561_v24 = vshll.u32 %v3406_v17, 16  ;;  %v4358_v46 = vld [vmem:[%s4646_s28 + $0x48] sm:$0xff]   ;;  %v4359_v2 = vld [vmem:[%s4646_s28 + $0x54] sm:$0xff]  }
  0x32   : > { %3819 = vmatmul.mubr.bf16.vlgmr.msra.gmra.mrb[0].mxu1 %v4341_v57  ;;  %v1517_v52 = vrot.slane %v1516_v44, 4  ;;  %v1567_v25 = vshll.u32 %v4783_v18, 16  ;;  %v1571_v28 = vshrl.u32 %v4783_v18, 16  ;;  %v1577_v29 = vshll.u32 %v4786_v19, 16  ;;  %v4827_v17 = vld [vmem:[%s4646_s28 + $0x68] sm:$0x1] }
  0x33   : > { %3947 = vmatmul.mubr.bf16.vlgmr.msra.gmra.mrb[0].mxu0 %v3432_v16  ;;  %3835 = vmatpush3.bf16.msra.mxu1 %v4342_v49  ;;  %v1526_v47 = vor.u32 %v1525_v40, %v1521_v39  ;;  %v4351_v49 = vld [vmem:[%s5531_s1 + $0x158] sm:$0xff]   ;;  %v1550_v20 = vor.u32 %v1549_v9, %v1545_v7  ;;  %v1560_v34 = vrot.slane %v1558_v23, 4  ;;  %v1563_v36 = vrot.slane %v1561_v24, 5 }
  0x34   : > { %3963 = vmatpush3.bf16.msra.mxu0 %v4343_v55  ;;  %3836 = vmatprep.subr.bf16.mxu1 %v4344_v0  ;;  %v3403_v55 = vld [vmem:[%s4646_s28 + $0x3c] sm:$0xf]  ;;  %v1579_v40 = vrot.slane %v1577_v29, 5 }
  0x35   : > { %3964 = vmatprep.subr.bf16.mxu0 %v4345_v6  ;;  %3822 = vmatprep.mubr.bf16.mxu1 %v4346_v10  ;;  %v1527_v57 = vrot.slane %v1526_v47, 4  ;;  %v1534_v59 = vshrl.u32 %v3403_v55, 16  ;;  %v1537_v61 = vshll.u32 %v3403_v55, 16  ;;  %v1555_v10 = vrot.slane %v1553_v3, 5  ;;  %v3409_v47 = vld [vmem:[%s4646_s28 + $0x54] sm:$0xf] }
  0x36   : > { %3950 = vmatprep.mubr.bf16.mxu0 %v3433_v51  ;;  %v1564_v43 = vor.u32 %v1563_v36, %v1560_v34  ;;  %v1875_v51 = vrot.slane %v1873_v50, 4  ;;  %v1582_v55 = vshrl.u32 %v3409_v47, 16 }
  0x37   : > { %3837 = vmatpush3.bf16.msra.mxu1 %v4344_v0  ;;  %v1522_v0 = vsel %vm4682_vm2, %v1517_v52, %v1521_v39  ;;  %v1532_v4 = vsel %vm4682_vm2, %v1527_v57, %v1531_v41  ;;  %v1536_v5 = vrot.slane %v1534_v59, 4  ;;  %v1573_v39 = vrot.slane %v1571_v28, 4 }
  0x38   : > { %3965 = vmatpush3.bf16.msra.mxu0 %v4345_v6  ;;  %3838 = vmatprep.subr.bf16.mxu1 %v4348_v26  ;;  %v1539_v6 = vrot.slane %v1537_v61, 5  ;;  %v3434_v8 = vcombine.low %v1522_v0, %v1532_v4  ;;  %v1565_v52 = vrot.slane %v1564_v43, 4  ;;  %v1585_v57 = vshll.u32 %v3409_v47, 16  ;;  %v437_v47 = vld [vmem:[%s4646_s28] sm:$0xf] }
  0x39   : > { %3966 = vmatprep.subr.bf16.mxu0 %v4349_v37  ;;  %v1584_v4 = vrot.slane %v1582_v55, 4  ;;  %v4851_v43 = vsel %vm4835_vm5, %v4703_v54, %v1883_v60  ;;  %v1877_v35 = vsel %vm4835_vm5, %v1875_v51, %v1876_v48  ;;  %v4865_v60 = vld [vmem:[%s4646_s28 + $0x4] sm:$0xf]  ;;  %v3447_v51 = vld [vmem:[%s4646_s28 + $0xc] sm:$0xe] }
  0x3a   : > { %3823 = vmatmul.mubr.bf16.gmra.mrb[4].mxu1 %v4347_v32  ;;  %v1540_v16 = vor.u32 %v1539_v6, %v1536_v5  ;;  %v1551_v32 = vrot.slane %v1550_v20, 4  ;;  %v1587_v5 = vrot.slane %v1585_v57, 5  ;;  %v4868_v57 = vld [vmem:[%s4646_s28 + $0x8] sm:$0x1]  ;;  %v474_v15 = vshll.u32 %v4865_v60, 16 }
  0x3b   : > { %3839 = vmatpush3.bf16.msra.mxu1 %v4348_v26  ;;  %3826 = vmatprep.mubr.bf16.mxu1 %v4352_v53  ;;  %v4356_v26 = vld [vmem:[%s5531_s1 + $0x68] sm:$0xff]   ;;  %v4809_v53 = vld [vmem:[%s4646_s28 + $0x5c] sm:$0x1]  ;;  %v484_v48 = vshll.u32 %v4868_v57, 16 }
  0x3c   : > { %3967 = vmatpush3.bf16.msra.mxu0 %v4349_v37  ;;  %3840 = vmatprep.subr.bf16.mxu1 %v4350_v45  ;;  %v1541_v27 = vrot.slane %v1540_v16, 4  ;;  %v1569_v37 = vrot.slane %v1567_v25, 5  ;;  %v1556_v41 = vsel %vm4682_vm2, %v1551_v32, %v1555_v10  ;;  %v1601_v0 = vshll.u32 %v4809_v53, 16  ;;  %v4824_v16 = vld [vmem:[%s4646_s28 + $0x64] sm:$0xf]  ;;  %v4362_v32 = vld [vmem:[%s5531_s1 + $0x78] sm:$0xff]  }
  0x3d   : > { %3968 = vmatprep.subr.bf16.mxu0 %v4351_v49  ;;  %3951 = vmatmul.mubr.bf16.gmra.mrb[4].mxu0 %v3434_v8  ;;  %v1615_v25 = vshll.u32 %v4824_v16, 16  ;;  %v1619_v29 = vshrl.u32 %v4824_v16, 16 }
  0x3e   : > { %v1546_v38 = vsel %vm4682_vm2, %v1541_v27, %v1545_v7  ;;  %v1570_v3 = vsel %vm4682_vm2, %v1565_v52, %v1569_v37  ;;  %v4360_v7 = vld [vmem:[%s5531_s1 + $0x70] sm:$0xff]   ;;  %v1603_v10 = vrot.slane %v1601_v0, 5  ;;  %v1887_v52 = vrot.slane %v4712_v62, 5  ;;  %v5423_v27 = vld [vmem:[%s5532_s2] ss:$0 sm:$0xff] }
  0x3f   : > { %3841 = vmatpush3.bf16.msra.mxu1 %v4350_v45  ;;  %v3435_v44 = vcombine.low %v1546_v38, %v1556_v41  ;;  %v1574_v45 = vor.u32 %v1573_v39, %v1569_v37  ;;  %v1617_v38 = vrot.slane %v1615_v25, 5  ;;  %v478_v0 = vshrl.u32 %v4865_v60, 16 }
  0x40   : > { %3969 = vmatpush3.bf16.msra.mxu0 %v4351_v49  ;;  %3842 = vmatprep.subr.bf16.mxu1 %v4354_v12  ;;  %v4804_v49 = vld [vmem:[%s4646_s28 + $0x58] sm:$0xf] }
  0x41   : > { %3970 = vmatprep.subr.bf16.mxu0 %v4355_v13  ;;  %v1591_v59 = vshll.u32 %v4804_v49, 16  ;;  %3954 = vmatprep.mubr.bf16.mxu0 %v3435_v44  ;;  %v1575_v61 = vrot.slane %v1574_v45, 4  ;;  %v1595_v63 = vshrl.u32 %v4804_v49, 16 }
  0x42   : > { %3827 = vmatmul.mubr.bf16.gmra.mrb[8].mxu1 %v4353_v11 }
  0x43   : > { %3843 = vmatpush3.bf16.msra.mxu1 %v4354_v12  ;;  %3830 = vmatprep.mubr.bf16.mxu1 %v4358_v46  ;;  %v1593_v6 = vrot.slane %v1591_v59, 5  ;;  %v1580_v8 = vsel %vm4682_vm2, %v1575_v61, %v1579_v40  ;;  %v1597_v9 = vrot.slane %v1595_v63, 4  ;;  %v1588_v12 = vor.u32 %v1587_v5, %v1584_v4  ;;  %v4363_v46 = vld [vmem:[%s5531_s1 + $0x178] sm:$0xff]  }
  0x44   : > { %3971 = vmatpush3.bf16.msra.mxu0 %v4355_v13  ;;  %3844 = vmatprep.subr.bf16.mxu1 %v4356_v26  ;;  %v3436_v11 = vcombine.low %v1570_v3, %v1580_v8  ;;  %v3412_v13 = vld [vmem:[%s4646_s28 + $0x60] sm:$0xf]  ;;  %v1621_v40 = vrot.slane %v1619_v29, 4  ;;  %v465_v59 = vshrl.u32 %v437_v47, 16  ;;  %v468_v61 = vshll.u32 %v437_v47, 16 }
  0x45   : > { %3972 = vmatprep.subr.bf16.mxu0 %v4357_v30  ;;  %v1598_v20 = vor.u32 %v1597_v9, %v1593_v6  ;;  %v1606_v23 = vshrl.u32 %v3412_v13, 16  ;;  %v1609_v24 = vshll.u32 %v3412_v13, 16  ;;  %v1589_v28 = vrot.slane %v1588_v12, 4  ;;  %v4883_v12 = vld [vmem:[%s5531_s1 + $0x80] sm:$0xff]  }
  0x46   : > { %3955 = vmatmul.mubr.bf16.gmra.mrb[8].mxu0 %v3436_v11  ;;  %v1622_v54 = vor.u32 %v1621_v40, %v1617_v38  ;;  %v467_v3 = vrot.slane %v465_v59, 4  ;;  %v470_v4 = vrot.slane %v468_v61, 5  ;;  %v3455_v5 = vrot.slane %v3447_v51, 9  ;;  %v4878_v11 = vld [vmem:[%s4646_s28 + $0x10] sm:$0xf] }
  0x47   : > { %3845 = vmatpush3.bf16.msra.mxu1 %v4356_v26  ;;  %v4361_v26 = vld [vmem:[%s5531_s1 + $0x170] sm:$0xff]   ;;  %v1599_v34 = vrot.slane %v1598_v20, 4  ;;  %v1608_v36 = vrot.slane %v1606_v23, 4  ;;  %v1611_v37 = vrot.slane %v1609_v24, 5  ;;  %v1594_v39 = vsel %vm4682_vm2, %v1589_v28, %v1593_v6  ;;  %v440_v6 = vld [vmem:[%s4646_s28 + $0xc] sm:$0xf] }
  0x48   : > { %3973 = vmatpush3.bf16.msra.mxu0 %v4357_v30  ;;  %3846 = vmatprep.subr.bf16.mxu1 %v4360_v7  ;;  %v1625_v30 = vshll.u32 %v4827_v17, 16  ;;  %v476_v8 = vrot.slane %v474_v15, 5  ;;  %v480_v9 = vrot.slane %v478_v0, 4  ;;  %v471_v20 = vor.u32 %v470_v4, %v467_v3  ;;  %v4892_v24 = vld [vmem:[%s4646_s28 + $0x14] sm:$0x1] }
  0x49   : > { %3974 = vmatprep.subr.bf16.mxu0 %v4361_v26  ;;  %v1604_v44 = vsel %vm4682_vm2, %v1599_v34, %v1603_v10  ;;  %v1612_v45 = vor.u32 %v1611_v37, %v1608_v36  ;;  %v486_v10 = vrot.slane %v484_v48, 5  ;;  %v1874_v23 = vsel %vm4835_vm5, %v3455_v5, %v1873_v50  ;;  %v3448_v34 = vld [vmem:[%s4646_s28 + $0x18] sm:$0xe]  ;;  %v4913_v0 = vld [vmem:[%s4646_s28 + $0x1c] sm:$0xf] }
  0x4a   : > { %3831 = vmatmul.mubr.bf16.gmra.mrb[12].mxu1 %v4359_v2  ;;  %v1627_v41 = vrot.slane %v1625_v30, 5  ;;  %v3437_v55 = vcombine.low %v1594_v39, %v1604_v44  ;;  %v1623_v2 = vrot.slane %v1622_v54, 4  ;;  %v489_v25 = vshrl.u32 %v440_v6, 16  ;;  %v443_v15 = vld [vmem:[%s4646_s28 + $0x18] sm:$0xf] }
  0x4b   : > { %3847 = vmatpush3.bf16.msra.mxu1 %v4360_v7  ;;  %v1613_v63 = vrot.slane %v1612_v45, 4  ;;  %v481_v29 = vor.u32 %v480_v9, %v476_v8  ;;  %v3479_v30 = vcombine.low %v1874_v23, %v1877_v35  ;;  %v472_v36 = vrot.slane %v471_v20, 4  ;;  %v4916_v48 = vld [vmem:[%s4646_s28 + $0x20] sm:$0x1]  ;;  %v4366_v9 = vld [vmem:[%s5531_s1 + $0x88] sm:$0xff]  }
  0x4c   : > { %3975 = vmatpush3.bf16.msra.mxu0 %v4361_v26  ;;  %3848 = vmatprep.subr.bf16.mxu1 %v4362_v32  ;;  %v1628_v13 = vsel %vm4682_vm2, %v1623_v2, %v1627_v41  ;;  %v4365_v26 = vld [vmem:[%s5531_s1 + $0x180] sm:$0xff]   ;;  %v491_v37 = vrot.slane %v489_v25, 4  ;;  %v498_v14 = vshll.u32 %v4878_v11, 16  ;;  %v502_v50 = vshrl.u32 %v4878_v11, 16  ;;  %v4932_v25 = vld [vmem:[%s4646_s28 + $0x28] sm:$0xf] }
  0x4d   : > { %3976 = vmatprep.subr.bf16.mxu0 %v4363_v46  ;;  %3958 = vmatprep.mubr.bf16.mxu0 %v3437_v55  ;;  %v1618_v7 = vsel %vm4682_vm2, %v1613_v63, %v1617_v38  ;;  %v482_v38 = vrot.slane %v481_v29, 4  ;;  %v508_v40 = vshll.u32 %v4892_v24, 16  ;;  %v3456_v41 = vrot.slane %v3448_v34, 9  ;;  %v4941_v34 = vld [vmem:[%s4646_s28 + $0x2c] sm:$0x1] }
  0x4e   : > { %v3438_v28 = vcombine.low %v1618_v7, %v1628_v13  ;;  %v477_v44 = vsel %vm4682_vm2, %v472_v36, %v476_v8  ;;  %v500_v45 = vrot.slane %v498_v14, 5  ;;  %v513_v2 = vshrl.u32 %v443_v15, 16  ;;  %v446_v7 = vld [vmem:[%s4646_s28 + $0x24] sm:$0xf] }
  0x4f   : > { %3849 = vmatpush3.bf16.msra.mxu1 %v4362_v32  ;;  %v492_v32 = vshll.u32 %v440_v6, 16  ;;  %v487_v47 = vsel %vm4682_vm2, %v482_v38, %v486_v10  ;;  %v510_v55 = vrot.slane %v508_v40, 5  ;;  %v1881_v54 = vsel %vm4835_vm5, %v3456_v41, %v1880_v42  ;;  %v4367_v10 = vld [vmem:[%s5531_s1 + $0x188] sm:$0xff]   ;;  %v3450_v38 = vld [vmem:[%s4646_s28 + $0x30] sm:$0xe] }
  0x50   : > { %3977 = vmatpush3.bf16.msra.mxu0 %v4363_v46  ;;  %3866 = vmatprep.subr.bf16.mxu1 %v4883_v12  ;;  %v504_v46 = vrot.slane %v502_v50, 4  ;;  %v3285_v59 = vcombine.low %v477_v44, %v487_v47  ;;  %v3480_v63 = vcombine.low %v1881_v54, %v4851_v43  ;;  %v516_v3 = vshll.u32 %v443_v15, 16  ;;  %v4368_v54 = vld [vmem:[%s5531_s1 + $0x90] sm:$0xff]  }
  0x51   : > { %3994 = vmatprep.subr.bf16.mxu0 %v4365_v26  ;;  %3959 = vmatmul.mubr.bf16.gmra.mrb[12].mxu0 %v3438_v28  ;;  %v494_v39 = vrot.slane %v492_v32, 5  ;;  %v522_v4 = vshll.u32 %v4913_v0, 16  ;;  %v526_v42 = vshrl.u32 %v4913_v0, 16  ;;  %v532_v6 = vshll.u32 %v4916_v48, 16 }
  0x52   : > { %3978 = vmatprep.mubr.bf16.mxu0 %v3479_v30  ;;  %v505_v61 = vor.u32 %v504_v46, %v500_v45  ;;  %3850 = vmatprep.mubr.bf16.mxu1 %v3285_v59  ;;  %v3457_v43 = vrot.slane %v3449_v31, 9  ;;  %v515_v13 = vrot.slane %v513_v2, 4  ;;  %v518_v20 = vrot.slane %v516_v3, 5 }
  0x53   : > { %v495_v35 = vor.u32 %v494_v39, %v491_v37  ;;  %v524_v23 = vrot.slane %v522_v4, 5  ;;  %v528_v29 = vrot.slane %v526_v42, 4  ;;  %v534_v30 = vrot.slane %v532_v6, 5  ;;  %v449_v6 = vld [vmem:[%s4646_s28 + $0x30] sm:$0xf] }
  0x54   : > { %v506_v5 = vrot.slane %v505_v61, 4  ;;  %v1888_v32 = vsel %vm4835_vm5, %v3457_v43, %v1887_v52  ;;  %v519_v37 = vor.u32 %v518_v20, %v515_v13  ;;  %v1889_v14 = vrot.slane %v1887_v52, 4  ;;  %v4970_v43 = vld [vmem:[%s4646_s28 + $0x34] sm:$0xf]  ;;  %v4979_v20 = vld [vmem:[%s4646_s28 + $0x38] sm:$0x1] }
  0x55   : > { %v496_v51 = vrot.slane %v495_v35, 4  ;;  %v1890_v50 = vrot.slane %v4718_v1, 5  ;;  %v529_v39 = vor.u32 %v528_v29, %v524_v23  ;;  %v537_v40 = vshrl.u32 %v446_v7, 16  ;;  %v4369_v1 = vld [vmem:[%s5531_s1 + $0x190] sm:$0xff]   ;;  %v3451_v29 = vld [vmem:[%s4646_s28 + $0x3c] sm:$0xe] }
  0x56   : > { %v511_v28 = vsel %vm4682_vm2, %v506_v5, %v510_v55  ;;  %v540_v41 = vshll.u32 %v446_v7, 16  ;;  %v546_v44 = vshll.u32 %v4932_v25, 16  ;;  %v550_v47 = vshrl.u32 %v4932_v25, 16 }
  0x57   : > { %v501_v8 = vsel %vm4682_vm2, %v496_v51, %v500_v45  ;;  %v520_v45 = vrot.slane %v519_v37, 4  ;;  %v1891_v46 = vsel %vm4835_vm5, %v1889_v14, %v1890_v50  ;;  %v556_v62 = vshll.u32 %v4941_v34, 16  ;;  %v452_v14 = vld [vmem:[%s4646_s28 + $0x3c] sm:$0xf]  ;;  %v4373_v50 = vld [vmem:[%s5531_s1 + $0x1a0] sm:$0xff]  }
  0x58   : > { %v3286_v36 = vcombine.low %v501_v8, %v511_v28  ;;  %v530_v52 = vrot.slane %v529_v39, 4  ;;  %v539_v35 = vrot.slane %v537_v40, 4  ;;  %v542_v55 = vrot.slane %v540_v41, 5 }
  0x59   : > { %3979 = vmatmul.mubr.bf16.vlgmr.msra.gmra.mrb[0].mxu0 %v3480_v63  ;;  %v525_v59 = vsel %vm4682_vm2, %v520_v45, %v524_v23  ;;  %v548_v61 = vrot.slane %v546_v44, 5  ;;  %v552_v63 = vrot.slane %v550_v47, 4  ;;  %v558_v15 = vrot.slane %v556_v62, 5  ;;  %v4996_v44 = vld [vmem:[%s4646_s28 + $0x40] sm:$0xf] }
  0x5a   : > { %3995 = vmatpush3.bf16.msra.mxu0 %v4365_v26  ;;  %3851 = vmatmul.mubr.bf16.vlgmr.msra.gmra.mrb[0].mxu1 %v3286_v36  ;;  %v3481_v26 = vcombine.low %v1888_v32, %v1891_v46  ;;  %v535_v51 = vsel %vm4682_vm2, %v530_v52, %v534_v30  ;;  %v543_v2 = vor.u32 %v542_v55, %v539_v35  ;;  %v3458_v3 = vrot.slane %v3450_v38, 9 }
  0x5b   : > { %3996 = vmatprep.subr.bf16.mxu0 %v4367_v10  ;;  %3867 = vmatpush3.bf16.msra.mxu1 %v4883_v12  ;;  %v4371_v12 = vld [vmem:[%s5531_s1 + $0x198] sm:$0xff]   ;;  %v1894_v4 = vrot.slane %v4733_v21, 5  ;;  %v3287_v31 = vcombine.low %v525_v59, %v535_v51  ;;  %v553_v5 = vor.u32 %v552_v63, %v548_v61  ;;  %v1897_v42 = vrot.slane %v4736_v22, 5  ;;  %v4372_v59 = vld [vmem:[%s5531_s1 + $0xa0] sm:$0xff]  }
  0x5c   : > { %3868 = vmatprep.subr.bf16.mxu1 %v4366_v9  ;;  %3982 = vmatprep.mubr.bf16.mxu0 %v3481_v26  ;;  %v1901_v7 = vrot.slane %v4762_v56, 5  ;;  %v544_v8 = vrot.slane %v543_v2, 4  ;;  %v4370_v21 = vld [vmem:[%s5531_s1 + $0x98] sm:$0xff]   ;;  %v561_v22 = vshrl.u32 %v449_v6, 16  ;;  %v564_v28 = vshll.u32 %v449_v6, 16 }
  0x5d   : > { %v1896_v13 = vrot.slane %v1894_v4, 4  ;;  %3854 = vmatprep.mubr.bf16.mxu1 %v3287_v31  ;;  %v554_v23 = vrot.slane %v553_v5, 4  ;;  %v570_v56 = vshll.u32 %v4970_v43, 16  ;;  %v580_v37 = vshll.u32 %v4979_v20, 16  ;;  %v4375_v31 = vld [vmem:[%s5531_s1 + $0x1a8] sm:$0xff]  }
  0x5e   : > { %3997 = vmatpush3.bf16.msra.mxu0 %v4367_v10  ;;  %v1895_v10 = vsel %vm4835_vm5, %v3458_v3, %v1894_v4  ;;  %v549_v30 = vsel %vm4682_vm2, %v544_v8, %v548_v61  ;;  %v563_v36 = vrot.slane %v561_v22, 4  ;;  %v566_v40 = vrot.slane %v564_v28, 5  ;;  %v3452_v61 = vld [vmem:[%s4646_s28 + $0x48] sm:$0xe] }
  0x5f   : > { %3998 = vmatprep.subr.bf16.mxu0 %v4369_v1  ;;  %3869 = vmatpush3.bf16.msra.mxu1 %v4366_v9  ;;  %v574_v9 = vshrl.u32 %v4970_v43, 16  ;;  %v1898_v32 = vsel %vm4835_vm5, %v1896_v13, %v1897_v42  ;;  %v559_v38 = vsel %vm4682_vm2, %v554_v23, %v558_v15  ;;  %v572_v41 = vrot.slane %v570_v56, 5 }
  0x60   : > { %3870 = vmatprep.subr.bf16.mxu1 %v4368_v54  ;;  %v3482_v39 = vcombine.low %v1895_v10, %v1898_v32  ;;  %v3288_v45 = vcombine.low %v549_v30, %v559_v38  ;;  %v582_v47 = vrot.slane %v580_v37, 5  ;;  %v3459_v62 = vrot.slane %v3451_v29, 9  ;;  %v455_v29 = vld [vmem:[%s4646_s28 + $0x48] sm:$0xf]  ;;  %v5030_v37 = vld [vmem:[%s4646_s28 + $0x4c] sm:$0xf] }
  0x61   : > { %v576_v46 = vrot.slane %v574_v9, 4  ;;  %v567_v52 = vor.u32 %v566_v40, %v563_v36  ;;  %v1903_v26 = vrot.slane %v1901_v7, 4  ;;  %v1904_v35 = vrot.slane %v4765_v58, 5 }
  0x62   : > { %3999 = vmatpush3.bf16.msra.mxu0 %v4369_v1  ;;  %v4999_v1 = vld [vmem:[%s4646_s28 + $0x44] sm:$0x1]  ;;  %v585_v55 = vshrl.u32 %v452_v14, 16  ;;  %3855 = vmatmul.mubr.bf16.gmra.mrb[4].mxu1 %v3288_v45  ;;  %v1902_v63 = vsel %vm4835_vm5, %v3459_v62, %v1901_v7  ;;  %v588_v15 = vshll.u32 %v452_v14, 16  ;;  %v594_v51 = vshll.u32 %v4996_v44, 16  ;;  %v4374_v7 = vld [vmem:[%s5531_s1 + $0xa8] sm:$0xff]  }
  0x63   : > { %4000 = vmatprep.subr.bf16.mxu0 %v4371_v12  ;;  %3871 = vmatpush3.bf16.msra.mxu1 %v4368_v54  ;;  %v577_v54 = vor.u32 %v576_v46, %v572_v41  ;;  %v568_v2 = vrot.slane %v567_v52, 4  ;;  %v1905_v3 = vsel %vm4835_vm5, %v1903_v26, %v1904_v35  ;;  %v598_v4 = vshrl.u32 %v4996_v44, 16  ;;  %v5033_v14 = vld [vmem:[%s4646_s28 + $0x50] sm:$0x1]  ;;  %v4379_v52 = vld [vmem:[%s5531_s1 + $0x1b8] sm:$0xff]  }
  0x64   : > { %3983 = vmatmul.mubr.bf16.gmra.mrb[4].mxu0 %v3482_v39  ;;  %3872 = vmatprep.subr.bf16.mxu1 %v4370_v21  ;;  %v587_v58 = vrot.slane %v585_v55, 4  ;;  %v3483_v5 = vcombine.low %v1902_v63, %v1905_v3  ;;  %v590_v42 = vrot.slane %v588_v15, 5  ;;  %v596_v6 = vrot.slane %v594_v51, 5  ;;  %v4376_v62 = vld [vmem:[%s5531_s1 + $0xb0] sm:$0xff]  }
  0x65   : > { %v573_v8 = vsel %vm4682_vm2, %v568_v2, %v572_v41  ;;  %v600_v10 = vrot.slane %v598_v4, 4  ;;  %v604_v13 = vshll.u32 %v4999_v1, 16  ;;  %v3460_v22 = vrot.slane %v3452_v61, 9  ;;  %v458_v61 = vld [vmem:[%s4646_s28 + $0x54] sm:$0xf] }
  0x66   : > { %4001 = vmatpush3.bf16.msra.mxu0 %v4371_v12  ;;  %v578_v12 = vrot.slane %v577_v54, 4  ;;  %3986 = vmatprep.mubr.bf16.mxu0 %v3483_v5  ;;  %v591_v28 = vor.u32 %v590_v42, %v587_v58  ;;  %v1908_v56 = vrot.slane %v4783_v18, 5  ;;  %v1911_v9 = vrot.slane %v4786_v19, 5  ;;  %v3453_v19 = vld [vmem:[%s4646_s28 + $0x54] sm:$0xe] }
  0x67   : > { %4002 = vmatprep.subr.bf16.mxu0 %v4373_v50  ;;  %3873 = vmatpush3.bf16.msra.mxu1 %v4370_v21  ;;  %v4377_v21 = vld [vmem:[%s5531_s1 + $0x1b0] sm:$0xff]   ;;  %v601_v32 = vor.u32 %v600_v10, %v596_v6  ;;  %v606_v36 = vrot.slane %v604_v13, 5  ;;  %v609_v38 = vshrl.u32 %v455_v29, 16  ;;  %v612_v18 = vshll.u32 %v455_v29, 16  ;;  %v5053_v54 = vld [vmem:[%s4646_s28 + $0x58] sm:$0xf] }
  0x68   : > { %3874 = vmatprep.subr.bf16.mxu1 %v4372_v59  ;;  %v583_v23 = vsel %vm4682_vm2, %v578_v12, %v582_v47  ;;  %v592_v39 = vrot.slane %v591_v28, 4  ;;  %v1909_v40 = vsel %vm4835_vm5, %v3460_v22, %v1908_v56  ;;  %v1910_v41 = vrot.slane %v1908_v56, 4  ;;  %v3454_v5 = vld [vmem:[%s4646_s28 + $0x60] sm:$0xe]  ;;  %v4378_v13 = vld [vmem:[%s5531_s1 + $0xb8] sm:$0xff]  }
  0x69   : > { %v3289_v30 = vcombine.low %v573_v8, %v583_v23  ;;  %v611_v45 = vrot.slane %v609_v38, 4  ;;  %v618_v46 = vshll.u32 %v5030_v37, 16  ;;  %v622_v47 = vshrl.u32 %v5030_v37, 16 }
  0x6a   : > { %4003 = vmatpush3.bf16.msra.mxu0 %v4373_v50  ;;  %v602_v50 = vrot.slane %v601_v32, 4  ;;  %v597_v26 = vsel %vm4682_vm2, %v592_v39, %v596_v6  ;;  %v1912_v35 = vsel %vm4835_vm5, %v1910_v41, %v1911_v9  ;;  %v614_v55 = vrot.slane %v612_v18, 5  ;;  %v866_v18 = vld [vmem:[%s4646_s28] sm:$0xe] }
  0x6b   : > { %4004 = vmatprep.subr.bf16.mxu0 %v4375_v31  ;;  %3875 = vmatpush3.bf16.msra.mxu1 %v4372_v59  ;;  %v628_v59 = vshll.u32 %v5033_v14, 16  ;;  %v3484_v15 = vcombine.low %v1909_v40, %v1912_v35  ;;  %v620_v51 = vrot.slane %v618_v46, 5  ;;  %v624_v2 = vrot.slane %v622_v47, 4  ;;  %v867_v47 = vld [vmem:[%s4646_s28 + $0xc] sm:$0xe] }
  0x6c   : > { %3858 = vmatprep.mubr.bf16.mxu1 %v3289_v30  ;;  %3876 = vmatprep.subr.bf16.mxu1 %v4374_v7  ;;  %v607_v63 = vsel %vm4682_vm2, %v602_v50, %v606_v36  ;;  %v615_v58 = vor.u32 %v614_v55, %v611_v45  ;;  %v3461_v12 = vrot.slane %v3453_v19, 9  ;;  %v1915_v6 = vrot.slane %v4804_v49, 5 }
  0x6d   : > { %v3290_v3 = vcombine.low %v597_v26, %v607_v63  ;;  %v630_v4 = vrot.slane %v628_v59, 5  ;;  %3987 = vmatmul.mubr.bf16.gmra.mrb[8].mxu0 %v3484_v15  ;;  %v625_v42 = vor.u32 %v624_v2, %v620_v51  ;;  %v1918_v8 = vrot.slane %v4809_v53, 5 }
  0x6e   : > { %4005 = vmatpush3.bf16.msra.mxu0 %v4375_v31  ;;  %v5058_v31 = vld [vmem:[%s4646_s28 + $0x5c] sm:$0x1]  ;;  %v633_v10 = vshrl.u32 %v458_v61, 16  ;;  %v636_v22 = vshll.u32 %v458_v61, 16  ;;  %v642_v23 = vshll.u32 %v5053_v54, 16  ;;  %v646_v28 = vshrl.u32 %v5053_v54, 16 }
  0x6f   : > { %4006 = vmatprep.subr.bf16.mxu0 %v4377_v21  ;;  %3877 = vmatpush3.bf16.msra.mxu1 %v4374_v7  ;;  %v616_v7 = vrot.slane %v615_v58, 4  ;;  %v626_v56 = vrot.slane %v625_v42, 4  ;;  %v1916_v49 = vsel %vm4835_vm5, %v3461_v12, %v1915_v6  ;;  %v1917_v53 = vrot.slane %v1915_v6, 4  ;;  %v4380_v12 = vld [vmem:[%s4646_s28 + $0x18] sm:$0xff]  }
  0x70   : > { %3878 = vmatprep.subr.bf16.mxu1 %v4376_v62  ;;  %3859 = vmatmul.mubr.bf16.gmra.mrb[8].mxu1 %v3290_v3  ;;  %v635_v9 = vrot.slane %v633_v10, 4  ;;  %v638_v30 = vrot.slane %v636_v22, 5  ;;  %v644_v32 = vrot.slane %v642_v23, 5  ;;  %v648_v36 = vrot.slane %v646_v28, 4  ;;  %v868_v22 = vld [vmem:[%s4646_s28 + $0x18] sm:$0xe] }
  0x71   : > { %v621_v29 = vsel %vm4682_vm2, %v616_v7, %v620_v51  ;;  %v631_v38 = vsel %vm4682_vm2, %v626_v56, %v630_v4  ;;  %v1919_v39 = vsel %vm4835_vm5, %v1917_v53, %v1918_v8  ;;  %v652_v40 = vshll.u32 %v5058_v31, 16 }
  0x72   : > { %4007 = vmatpush3.bf16.msra.mxu0 %v4377_v21  ;;  %v5075_v21 = vld [vmem:[%s5531_s1 + $0xc0] sm:$0xff]   ;;  %v3462_v41 = vrot.slane %v3454_v5, 9  ;;  %v3291_v19 = vcombine.low %v621_v29, %v631_v38  ;;  %v3485_v50 = vcombine.low %v1916_v49, %v1919_v39  ;;  %v639_v45 = vor.u32 %v638_v30, %v635_v9  ;;  %v4384_v38 = vld [vmem:[%s5531_s1 + $0xc8] sm:$0xff]  }
  0x73   : > { %4008 = vmatprep.subr.bf16.mxu0 %v4379_v52  ;;  %3879 = vmatpush3.bf16.msra.mxu1 %v4376_v62  ;;  %v649_v46 = vor.u32 %v648_v36, %v644_v32  ;;  %v654_v62 = vrot.slane %v652_v40, 5  ;;  %v1922_v26 = vrot.slane %v4824_v16, 5  ;;  %v1925_v35 = vrot.slane %v4827_v17, 5  ;;  %v4383_v17 = vld [vmem:[%s5531_s1 + $0x1c0] sm:$0xff]   ;;  %v4386_v40 = vld [vmem:[%s4646_s28 + $0x30] sm:$0xff]  }
  0x74   : > { %3880 = vmatprep.subr.bf16.mxu1 %v4378_v13  ;;  %v3301_v55 = vrot.slane %v866_v18, 9  ;;  %3862 = vmatprep.mubr.bf16.mxu1 %v3291_v19  ;;  %v640_v59 = vrot.slane %v639_v45, 4  ;;  %v903_v63 = vrot.slane %v4865_v60, 5  ;;  %v906_v15 = vrot.slane %v4868_v57, 5  ;;  %v4382_v9 = vld [vmem:[%s4646_s28 + $0x24] sm:$0xff]  }
  0x75   : > { %3990 = vmatprep.mubr.bf16.mxu0 %v3485_v50  ;;  %v650_v61 = vrot.slane %v649_v46, 4  ;;  %v1923_v51 = vsel %vm4835_vm5, %v3462_v41, %v1922_v26  ;;  %v3302_v2 = vrot.slane %v867_v47, 9  ;;  %v910_v16 = vrot.slane %v4878_v11, 5  ;;  %v870_v41 = vld [vmem:[%s4646_s28 + $0x30] sm:$0xe] }
  0x76   : > { %4009 = vmatpush3.bf16.msra.mxu0 %v4379_v52  ;;  %v1924_v52 = vrot.slane %v1922_v26, 4  ;;  %v645_v3 = vsel %vm4682_vm2, %v640_v59, %v644_v32  ;;  %v904_v57 = vsel %vm4835_vm5, %v3301_v55, %v903_v63  ;;  %v905_v58 = vrot.slane %v903_v63, 4  ;;  %v4387_v46 = vld [vmem:[%s5531_s1 + $0xd0] sm:$0xff]   ;;  %v4388_v26 = vld [vmem:[%s4646_s28 + $0x3c] sm:$0xff]  }
  0x77   : > { %3881 = vmatpush3.bf16.msra.mxu1 %v4378_v13  ;;  %v655_v60 = vsel %vm4682_vm2, %v650_v61, %v654_v62  ;;  %v912_v5 = vrot.slane %v910_v16, 4  ;;  %4026 = vmatprep.subr.bf16.mxu0 %v4383_v17  ;;  %v913_v8 = vrot.slane %v4892_v24, 5  ;;  %v917_v10 = vrot.slane %v4913_v0, 5  ;;  %v869_v24 = vld [vmem:[%s4646_s28 + $0x24] sm:$0xe] }
  0x78   : > { %3898 = vmatprep.subr.bf16.mxu1 %v5075_v21  ;;  %v3292_v4 = vcombine.low %v645_v3, %v655_v60  ;;  %v1926_v11 = vsel %vm4835_vm5, %v1924_v52, %v1925_v35  ;;  %v907_v6 = vsel %vm4835_vm5, %v905_v58, %v906_v15  ;;  %v911_v7 = vsel %vm4835_vm5, %v3302_v2, %v910_v16  ;;  %v4389_v35 = vld [vmem:[%s5531_s1 + $0x1d0] sm:$0xff]   ;;  %v4390_v15 = vld [vmem:[%s5531_s1 + $0xd8] sm:$0xff]  }
  0x79   : > { %v3486_v42 = vcombine.low %v1923_v51, %v1926_v11  ;;  %v3325_v13 = vcombine.low %v904_v57, %v907_v6  ;;  %v920_v23 = vrot.slane %v4916_v48, 5  ;;  %v914_v28 = vsel %vm4835_vm5, %v912_v5, %v913_v8  ;;  %v872_v51 = vld [vmem:[%s4646_s28 + $0x48] sm:$0xe]  ;;  %v4391_v52 = vld [vmem:[%s5531_s1 + $0x1d8] sm:$0xff]   ;;  %v4393_v57 = vld [vmem:[%s5531_s1 + $0xe0] sm:$0xff]  }
  0x7a   : > { %3863 = vmatmul.mubr.bf16.gmra.mrb[12].mxu1 %v3292_v4  ;;  %v3303_v56 = vrot.slane %v868_v22, 9  ;;  %v919_v49 = vrot.slane %v917_v10, 4  ;;  %v924_v0 = vrot.slane %v4932_v25, 5  ;;  %v3326_v53 = vcombine.low %v911_v7, %v914_v28  ;;  %v4385_v25 = vld [vmem:[%s5531_s1 + $0x1c8] sm:$0xff]   ;;  %v873_v4 = vld [vmem:[%s4646_s28 + $0x54] sm:$0xe] }
  0x7b   : > { %3991 = vmatmul.mubr.bf16.gmra.mrb[12].mxu0 %v3486_v42  ;;  %3882 = vmatprep.mubr.bf16.mxu1 %v3325_v13  ;;  %v927_v29 = vrot.slane %v4941_v34, 5  ;;  %v3304_v32 = vrot.slane %v869_v24, 9  ;;  %v931_v39 = vrot.slane %v4970_v43, 5  ;;  %v934_v18 = vrot.slane %v4979_v20, 5  ;;  %v871_v20 = vld [vmem:[%s4646_s28 + $0x3c] sm:$0xe] }
  0x7c   : > { %4010 = vmatprep.mubr.bf16.mxu0 %v4380_v12  ;;  %v918_v48 = vsel %vm4835_vm5, %v3303_v56, %v917_v10  ;;  %v921_v30 = vsel %vm4835_vm5, %v919_v49, %v920_v23  ;;  %v926_v36 = vrot.slane %v924_v0, 4  ;;  %v3305_v45 = vrot.slane %v870_v41, 9  ;;  %v4395_v11 = vld [vmem:[%s5531_s1 + $0x1e0] sm:$0xff]   ;;  %v4397_v8 = vld [vmem:[%s5531_s1 + $0x1e8] sm:$0xff]   ;;  %v3545_v22 = vld [vmem:[%s4646_s28 + $0x18] sm:$0xf] }
  0x7d   : > { %v3327_v34 = vcombine.low %v918_v48, %v921_v30  ;;  %v925_v19 = vsel %vm4835_vm5, %v3304_v32, %v924_v0  ;;  %v933_v43 = vrot.slane %v931_v39, 4  ;;  %v938_v47 = vrot.slane %v4996_v44, 5  ;;  %v4398_v7 = vld [vmem:[%s4646_s28 + $0x60] sm:$0xff]   ;;  %v5188_v28 = vld [vmem:[%s4646_s28 + $0x1c] sm:$0xf]  ;;  %v4399_v24 = vld [vmem:[%s5531_s1 + $0xf0] sm:$0xff]  }
  0x7e   : > { %v928_v50 = vsel %vm4835_vm5, %v926_v36, %v927_v29  ;;  %v941_v55 = vrot.slane %v4999_v1, 5  ;;  %v945_v59 = vrot.slane %v5030_v37, 5  ;;  %v3306_v61 = vrot.slane %v871_v20, 9  ;;  %v4392_v1 = vld [vmem:[%s4646_s28 + $0x48] sm:$0xff]   ;;  %v5191_v56 = vld [vmem:[%s4646_s28 + $0x20] sm:$0x1] }
  0x7f   : > { %v3328_v62 = vcombine.low %v925_v19, %v928_v50  ;;  %v935_v44 = vsel %vm4835_vm5, %v933_v43, %v934_v18  ;;  %v940_v63 = vrot.slane %v938_v47, 4  ;;  %v3307_v37 = vrot.slane %v872_v51, 9  ;;  %v3548_v36 = vld [vmem:[%s4646_s28 + $0x24] sm:$0xf]  ;;  %v4400_v41 = vld [vmem:[%s4646_s28 + $0x6c] sm:$0xff]   ;;  %v4402_v20 = vld [vmem:[%s5531_s1 + $0xf8] sm:$0xff]  }
  0x80   : > { %v947_v16 = vrot.slane %v945_v59, 4  ;;  %v939_v3 = vsel %vm4835_vm5, %v3306_v61, %v938_v47  ;;  %v952_v58 = vrot.slane %v5053_v54, 5  ;;  %v4396_v54 = vld [vmem:[%s5531_s1 + $0xe8] sm:$0xff]   ;;  %v955_v6 = vrot.slane %v5058_v31, 5  ;;  %v4401_v18 = vld [vmem:[%s5531_s1 + $0x1f0] sm:$0xff]   ;;  %v4403_v61 = vld [vmem:[%s5531_s1 + $0x1f8] sm:$0xff]  }
  0x81   : > { %v942_v60 = vsel %vm4835_vm5, %v940_v63, %v941_v55  ;;  %v946_v5 = vsel %vm4835_vm5, %v3307_v37, %v945_v59  ;;  %v3308_v10 = vrot.slane %v873_v4, 9  ;;  %v2408_v49 = vshrl.u32 %v3545_v22, 16  ;;  %v5212_v50 = vld [vmem:[%s4646_s28 + $0x2c] sm:$0x1]  ;;  %v3551_v37 = vld [vmem:[%s4646_s28 + $0x30] sm:$0xf] }
  0x82   : > { %3883 = vmatmul.mubr.bf16.vlgmr.msra.gmra.mrb[0].mxu1 %v3326_v53  ;;  %v3330_v12 = vcombine.low %v939_v3, %v942_v60  ;;  %v954_v13 = vrot.slane %v952_v58, 4  ;;  %v2411_v31 = vshll.u32 %v3545_v22, 16  ;;  %v2417_v0 = vshll.u32 %v5188_v28, 16  ;;  %v4404_v63 = vld [vmem:[%s4646_s28 + $0xc] sm:$0xff]   ;;  %v5233_v3 = vld [vmem:[%s4646_s28 + $0x38] sm:$0x1] }
  0x83   : > { %4011 = vmatmul.mubr.bf16.vlgmr.msra.gmra.mrb[0].mxu0 %v4382_v9  ;;  %3899 = vmatpush3.bf16.msra.mxu1 %v5075_v21  ;;  %v932_v21 = vsel %vm4835_vm5, %v3305_v45, %v931_v39  ;;  %v2421_v53 = vshrl.u32 %v5188_v28, 16  ;;  %v2427_v9 = vshll.u32 %v5191_v56, 16  ;;  %v953_v29 = vsel %vm4835_vm5, %v3308_v10, %v952_v58  ;;  %v3554_v22 = vld [vmem:[%s4646_s28 + $0x3c] sm:$0xf] }
  0x84   : > { %4027 = vmatpush3.bf16.msra.mxu0 %v4383_v17  ;;  %3900 = vmatprep.subr.bf16.mxu1 %v4384_v38  ;;  %v3329_v2 = vcombine.low %v932_v21, %v935_v44  ;;  %v948_v17 = vrot.slane %v5033_v14, 5  ;;  %v4394_v14 = vld [vmem:[%s4646_s28 + $0x54] sm:$0xff]   ;;  %v956_v48 = vsel %vm4835_vm5, %v954_v13, %v955_v6  ;;  %v2410_v30 = vrot.slane %v2408_v49, 4 }
  0x85   : > { %4028 = vmatprep.subr.bf16.mxu0 %v4385_v25  ;;  %3886 = vmatprep.mubr.bf16.mxu1 %v3327_v34  ;;  %v2413_v32 = vrot.slane %v2411_v31, 5  ;;  %v2423_v39 = vrot.slane %v2421_v53, 4  ;;  %v5205_v34 = vld [vmem:[%s4646_s28 + $0x28] sm:$0xf]  ;;  %v2435_v45 = vshll.u32 %v3548_v36, 16  ;;  %v3332_v47 = vcombine.low %v953_v29, %v956_v48 }
  0x86   : > { %4014 = vmatprep.mubr.bf16.mxu0 %v4386_v40  ;;  %v949_v42 = vsel %vm4835_vm5, %v947_v16, %v948_v17  ;;  %v2432_v40 = vshrl.u32 %v3548_v36, 16  ;;  %v2441_v43 = vshll.u32 %v5205_v34, 16  ;;  %v5230_v17 = vld [vmem:[%s4646_s28 + $0x34] sm:$0xf]  ;;  %v2456_v60 = vshrl.u32 %v3551_v37, 16  ;;  %v4407_v31 = vld [vmem:[%s5531_s1 + $0x208] sm:$0xff]  }
  0x87   : > { %3901 = vmatpush3.bf16.msra.mxu1 %v4384_v38  ;;  %v3331_v23 = vcombine.low %v946_v5, %v949_v42  ;;  %v2419_v38 = vrot.slane %v2417_v0, 5  ;;  %v2414_v19 = vor.u32 %v2413_v32, %v2410_v30  ;;  %v2437_v44 = vrot.slane %v2435_v45, 5 }
  0x88   : > { %4029 = vmatpush3.bf16.msra.mxu0 %v4385_v25  ;;  %3902 = vmatprep.subr.bf16.mxu1 %v4387_v46  ;;  %v2429_v25 = vrot.slane %v2427_v9, 5  ;;  %v2443_v55 = vrot.slane %v2441_v43, 5  ;;  %v2469_v42 = vshrl.u32 %v5230_v17, 16  ;;  %v2475_v6 = vshll.u32 %v5233_v3, 16  ;;  %v5254_v9 = vld [vmem:[%s4646_s28 + $0x44] sm:$0x1] }
  0x89   : > { %4030 = vmatprep.subr.bf16.mxu0 %v4389_v35  ;;  %v2415_v21 = vrot.slane %v2414_v19, 4  ;;  %v2480_v29 = vshrl.u32 %v3554_v22, 16  ;;  %v2483_v48 = vshll.u32 %v3554_v22, 16 }
  0x8a   : > { %3887 = vmatmul.mubr.bf16.gmra.mrb[4].mxu1 %v3328_v62  ;;  %v2424_v62 = vor.u32 %v2423_v39, %v2419_v38  ;;  %v2471_v0 = vrot.slane %v2469_v42, 4  ;;  %v2477_v53 = vrot.slane %v2475_v6, 5  ;;  %v2499_v39 = vshll.u32 %v5254_v9, 16 }
  0x8b   : > { %4015 = vmatmul.mubr.bf16.gmra.mrb[4].mxu0 %v4388_v26  ;;  %3903 = vmatpush3.bf16.msra.mxu1 %v4387_v46  ;;  %v2445_v46 = vshrl.u32 %v5205_v34, 16  ;;  %v2434_v26 = vrot.slane %v2432_v40, 4  ;;  %v2482_v40 = vrot.slane %v2480_v29, 4 }
  0x8c   : > { %4031 = vmatpush3.bf16.msra.mxu0 %v4389_v35  ;;  %3904 = vmatprep.subr.bf16.mxu1 %v4390_v15  ;;  %v2451_v35 = vshll.u32 %v5212_v50, 16 }
  0x8d   : > { %4032 = vmatprep.subr.bf16.mxu0 %v4391_v52  ;;  %3890 = vmatprep.mubr.bf16.mxu1 %v3329_v2  ;;  %v2447_v59 = vrot.slane %v2445_v46, 4  ;;  %v2438_v2 = vor.u32 %v2437_v44, %v2434_v26  ;;  %v2501_v46 = vrot.slane %v2499_v39, 5  ;;  %v5264_v26 = vld [vmem:[%s4646_s28 + $0x4c] sm:$0xf]  ;;  %v4410_v44 = vld [vmem:[%s5531_s1 + $0x210] sm:$0xff]  }
  0x8e   : > { %4018 = vmatprep.mubr.bf16.mxu0 %v4392_v1  ;;  %v2453_v51 = vrot.slane %v2451_v35, 5  ;;  %v5267_v35 = vld [vmem:[%s4646_s28 + $0x50] sm:$0x1]  ;;  %v4413_v39 = vld [vmem:[%s4646_s28 + $0x48] sm:$0xff]  }
  0x8f   : > { %3905 = vmatpush3.bf16.msra.mxu1 %v4390_v15  ;;  %v2425_v15 = vrot.slane %v2424_v62, 4  ;;  %v2448_v1 = vor.u32 %v2447_v59, %v2443_v55  ;;  %v2439_v4 = vrot.slane %v2438_v2, 4  ;;  %v3557_v62 = vld [vmem:[%s4646_s28 + $0x48] sm:$0xf]  ;;  %v2517_v2 = vshrl.u32 %v5264_v26, 16 }
  0x90   : > { %4033 = vmatpush3.bf16.msra.mxu0 %v4391_v52  ;;  %3906 = vmatprep.subr.bf16.mxu1 %v4393_v57  ;;  %v2420_v52 = vsel %vm4682_vm2, %v2415_v21, %v2419_v38  ;;  %v2507_v59 = vshll.u32 %v3557_v62, 16 }
  0x91   : > { %4034 = vmatprep.subr.bf16.mxu0 %v4395_v11  ;;  %v2430_v16 = vsel %vm4682_vm2, %v2425_v15, %v2429_v25  ;;  %v2444_v10 = vsel %vm4682_vm2, %v2439_v4, %v2443_v55  ;;  %v4408_v25 = vld [vmem:[%s4646_s28 + $0x24] sm:$0xff]   ;;  %v2504_v55 = vshrl.u32 %v3557_v62, 16  ;;  %v4409_v15 = vld [vmem:[%s4646_s28 + $0x30] sm:$0xff]  }
  0x92   : > { %3891 = vmatmul.mubr.bf16.gmra.mrb[8].mxu1 %v3330_v12  ;;  %v3585_v58 = vcombine.low %v2420_v52, %v2430_v16  ;;  %v2465_v12 = vshll.u32 %v5230_v17, 16  ;;  %v2509_v16 = vrot.slane %v2507_v59, 5 }
  0x93   : > { %4019 = vmatmul.mubr.bf16.gmra.mrb[8].mxu0 %v4394_v14  ;;  %3907 = vmatpush3.bf16.msra.mxu1 %v4393_v57  ;;  %v2459_v57 = vshll.u32 %v3551_v37, 16  ;;  %v2449_v14 = vrot.slane %v2448_v1, 4  ;;  %v4411_v1 = vld [vmem:[%s5531_s1 + $0x218] sm:$0xff]   ;;  %v2506_v37 = vrot.slane %v2504_v55, 4 }
  0x94   : > { %4035 = vmatpush3.bf16.msra.mxu0 %v4395_v11  ;;  %3908 = vmatprep.subr.bf16.mxu1 %v4396_v54  ;;  %v4406_v11 = vld [vmem:[%s5531_s1 + $0x200] sm:$0xff]  }
  0x95   : > { %4036 = vmatprep.subr.bf16.mxu0 %v4397_v8  ;;  %3894 = vmatprep.mubr.bf16.mxu1 %v3331_v23  ;;  %v2461_v5 = vrot.slane %v2459_v57, 5  ;;  %v2454_v13 = vsel %vm4682_vm2, %v2449_v14, %v2453_v51  ;;  %v5248_v23 = vld [vmem:[%s4646_s28 + $0x40] sm:$0xf]  ;;  %v2523_v57 = vshll.u32 %v5267_v35, 16  ;;  %v2510_v6 = vor.u32 %v2509_v16, %v2506_v37  ;;  %v3566_v16 = vld [vmem:[%s4646_s28 + $0x6c] sm:$0xf] }
  0x96   : > { %4022 = vmatprep.mubr.bf16.mxu0 %v4398_v7  ;;  %v2467_v7 = vrot.slane %v2465_v12, 5  ;;  %v3586_v49 = vcombine.low %v2444_v10, %v2454_v13  ;;  %v2489_v30 = vshll.u32 %v5248_v23, 16  ;;  %v2493_v32 = vshrl.u32 %v5248_v23, 16  ;;  %v5287_v12 = vld [vmem:[%s4646_s28 + $0x58] sm:$0xf]  ;;  %v4412_v13 = vld [vmem:[%s4646_s28 + $0x3c] sm:$0xff]  }
  0x97   : > { %3909 = vmatpush3.bf16.msra.mxu1 %v4396_v54  ;;  %v2458_v54 = vrot.slane %v2456_v60, 4 }
  0x98   : > { %4037 = vmatpush3.bf16.msra.mxu0 %v4397_v8  ;;  %3910 = vmatprep.subr.bf16.mxu1 %v4399_v24  ;;  %v4405_v8 = vld [vmem:[%s4646_s28 + $0x18] sm:$0xff]   ;;  %v2472_v38 = vor.u32 %v2471_v0, %v2467_v7  ;;  %v2495_v19 = vrot.slane %v2493_v32, 4  ;;  %v2511_v0 = vrot.slane %v2510_v6, 4  ;;  %v2579_v6 = vshll.u32 %v3566_v16, 16 }
  0x99   : > { %4038 = vmatprep.subr.bf16.mxu0 %v4401_v18 }
  0x9a   : > { %3895 = vmatmul.mubr.bf16.gmra.mrb[12].mxu1 %v3332_v47  ;;  %v2473_v43 = vrot.slane %v2472_v38, 4 }
  0x9b   : > { %4023 = vmatmul.mubr.bf16.gmra.mrb[12].mxu0 %v4400_v41  ;;  %3911 = vmatpush3.bf16.msra.mxu1 %v4399_v24  ;;  %v2462_v24 = vor.u32 %v2461_v5, %v2458_v54  ;;  %v2485_v41 = vrot.slane %v2483_v48, 5  ;;  %v3562_v54 = vld [vmem:[%s4646_s28 + $0x5c] sm:$0x1] }
  0x9c   : > { %4039 = vmatpush3.bf16.msra.mxu0 %v4401_v18  ;;  %3912 = vmatprep.subr.bf16.mxu1 %v4402_v20  ;;  %v2491_v18 = vrot.slane %v2489_v30, 5  ;;  %v2478_v21 = vsel %vm4682_vm2, %v2473_v43, %v2477_v53  ;;  %v2547_v29 = vshll.u32 %v3562_v54, 16  ;;  %v3563_v43 = vld [vmem:[%s4646_s28 + $0x60] sm:$0xf] }
  0x9d   : > { %4040 = vmatprep.subr.bf16.mxu0 %v4403_v61  ;;  %3914 = vmatprep.mubr.bf16.mxu1 %v4404_v63  ;;  %v2463_v36 = vrot.slane %v2462_v24, 4  ;;  %v2486_v47 = vor.u32 %v2485_v41, %v2482_v40  ;;  %v2541_v24 = vshrl.u32 %v5287_v12, 16  ;;  %v2552_v55 = vshrl.u32 %v3563_v43, 16 }
  0x9e   : > { %4042 = vmatprep.mubr.bf16.mxu0 %v3585_v58  ;;  %v3560_v58 = vld [vmem:[%s4646_s28 + $0x54] sm:$0xf]  ;;  %v2549_v40 = vrot.slane %v2547_v29, 5  ;;  %v2555_v59 = vshll.u32 %v3563_v43, 16  ;;  %v2843_v29 = vrot.slane %v5188_v28, 5  ;;  %v2846_v43 = vrot.slane %v5191_v56, 5 }
  0x9f   : > { %3913 = vmatpush3.bf16.msra.mxu1 %v4402_v20  ;;  %v2468_v45 = vsel %vm4682_vm2, %v2463_v36, %v2467_v7  ;;  %v2496_v20 = vor.u32 %v2495_v19, %v2491_v18  ;;  %v2487_v51 = vrot.slane %v2486_v47, 4  ;;  %v2528_v5 = vshrl.u32 %v3560_v58, 16  ;;  %v5309_v47 = vld [vmem:[%s4646_s28 + $0x68] sm:$0x1] }
  0xa0   : > { %4041 = vmatpush3.bf16.msra.mxu0 %v4403_v61  ;;  %4090 = vmatprep.subr.bf16.mxu1 %v4406_v11  ;;  %v2513_v61 = vshll.u32 %v5264_v26, 16  ;;  %v3587_v63 = vcombine.low %v2468_v45, %v2478_v21  ;;  %v2531_v10 = vshll.u32 %v3560_v58, 16  ;;  %v2543_v32 = vrot.slane %v2541_v24, 4  ;;  %v5314_v21 = vld [vmem:[%s5531_s1 + $0x228] sm:$0xff]   ;;  %v4417_v24 = vld [vmem:[%s4646_s28 + $0x60] sm:$0xff]  }
  0xa1   : > { %4058 = vmatprep.subr.bf16.mxu0 %v4406_v11  ;;  %v2497_v52 = vrot.slane %v2496_v20, 4  ;;  %v2492_v4 = vsel %vm4682_vm2, %v2487_v51, %v2491_v18  ;;  %v2530_v22 = vrot.slane %v2528_v5, 4  ;;  %v2881_v36 = vrot.slane %v3562_v54, 5  ;;  %v4414_v18 = vld [vmem:[%s5531_s1 + $0x220] sm:$0xff]  }
  0xa2   : > { %3915 = vmatmul.mubr.bf16.vlgmr.msra.gmra.mrb[0].mxu1 %v4405_v8  ;;  %v2515_v60 = vrot.slane %v2513_v61, 5  ;;  %v2525_v8 = vrot.slane %v2523_v57, 5  ;;  %v2533_v53 = vrot.slane %v2531_v10, 5  ;;  %v2571_v51 = vshll.u32 %v5309_v47, 16 }
  0xa3   : > { %4043 = vmatmul.mubr.bf16.vlgmr.msra.gmra.mrb[0].mxu0 %v3586_v49  ;;  %4098 = vmatpush3.bf16.msra.mxu1 %v4406_v11  ;;  %v2502_v14 = vsel %vm4682_vm2, %v2497_v52, %v2501_v46  ;;  %v2537_v49 = vshll.u32 %v5287_v12, 16  ;;  %v5306_v46 = vld [vmem:[%s4646_s28 + $0x64] sm:$0xf]  ;;  %v2557_v37 = vrot.slane %v2555_v59, 5 }
  0xa4   : > { %4059 = vmatpush3.bf16.msra.mxu0 %v4406_v11  ;;  %4091 = vmatprep.subr.bf16.mxu1 %v4407_v31  ;;  %v2519_v11 = vrot.slane %v2517_v2, 4  ;;  %v3588_v42 = vcombine.low %v2492_v4, %v2502_v14  ;;  %v2516_v38 = vsel %vm4682_vm2, %v2511_v0, %v2515_v60  ;;  %v2554_v2 = vrot.slane %v2552_v55, 4  ;;  %v4419_v55 = vld [vmem:[%s5531_s1 + $0x238] sm:$0xff]  }
  0xa5   : > { %4060 = vmatprep.subr.bf16.mxu0 %v4407_v31  ;;  %3918 = vmatprep.mubr.bf16.mxu1 %v4408_v25  ;;  %v2539_v30 = vrot.slane %v2537_v49, 5  ;;  %v2534_v25 = vor.u32 %v2533_v53, %v2530_v22  ;;  %v2573_v14 = vrot.slane %v2571_v51, 5  ;;  %v4418_v22 = vld [vmem:[%s5531_s1 + $0x230] sm:$0xff]   ;;  %v2581_v53 = vrot.slane %v2579_v6, 5  ;;  %v3607_v6 = vld [vmem:[%s4646_s28 + $0x60] sm:$0xe] }
  0xa6   : > { %4046 = vmatprep.mubr.bf16.mxu0 %v3587_v63  ;;  %v2520_v7 = vor.u32 %v2519_v11, %v2515_v60  ;;  %v2561_v63 = vshll.u32 %v5306_v46, 16  ;;  %v5324_v60 = vld [vmem:[%s4646_s28 + $0x70] sm:$0xf]  ;;  %v5333_v11 = vld [vmem:[%s4646_s28 + $0x74] sm:$0x1]  ;;  %v2558_v5 = vor.u32 %v2557_v37, %v2554_v2  ;;  %v2874_v51 = vrot.slane %v5267_v35, 5 }
  0xa7   : > { %4099 = vmatpush3.bf16.msra.mxu1 %v4407_v31  ;;  %v2544_v45 = vor.u32 %v2543_v32, %v2539_v30  ;;  %v2535_v62 = vrot.slane %v2534_v25, 4  ;;  %v2585_v10 = vshll.u32 %v5324_v60, 16  ;;  %v3603_v2 = vld [vmem:[%s4646_s28 + $0x30] sm:$0xe]  ;;  %v2850_v35 = vrot.slane %v5205_v34, 5 }
  0xa8   : > { %4061 = vmatpush3.bf16.msra.mxu0 %v4407_v31  ;;  %4092 = vmatprep.subr.bf16.mxu1 %v4410_v44  ;;  %v2878_v31 = vrot.slane %v5287_v12, 5  ;;  %v2521_v48 = vrot.slane %v2520_v7, 4  ;;  %v2563_v4 = vrot.slane %v2561_v63, 5  ;;  %v2595_v7 = vshll.u32 %v5333_v11, 16  ;;  %v3606_v63 = vld [vmem:[%s4646_s28 + $0x54] sm:$0xe] }
  0xa9   : > { %4062 = vmatprep.subr.bf16.mxu0 %v4410_v44  ;;  %v2545_v61 = vrot.slane %v2544_v45, 4  ;;  %v2540_v52 = vsel %vm4682_vm2, %v2535_v62, %v2539_v30  ;;  %v2559_v49 = vrot.slane %v2558_v5, 4  ;;  %v2587_v30 = vrot.slane %v2585_v10, 5  ;;  %v3602_v45 = vld [vmem:[%s4646_s28 + $0x24] sm:$0xe] }
  0xaa   : > { %3919 = vmatmul.mubr.bf16.gmra.mrb[4].mxu1 %v4409_v15  ;;  %v2880_v41 = vrot.slane %v2878_v31, 4  ;;  %v2526_v19 = vsel %vm4682_vm2, %v2521_v48, %v2525_v8  ;;  %v2565_v15 = vshrl.u32 %v5306_v46, 16  ;;  %v3611_v5 = vrot.slane %v3603_v2, 9 }
  0xab   : > { %4047 = vmatmul.mubr.bf16.gmra.mrb[4].mxu0 %v3588_v42  ;;  %4100 = vmatpush3.bf16.msra.mxu1 %v4410_v44  ;;  %v3589_v20 = vcombine.low %v2516_v38, %v2526_v19  ;;  %v2550_v58 = vsel %vm4682_vm2, %v2545_v61, %v2549_v40  ;;  %v2576_v42 = vshrl.u32 %v3566_v16, 16  ;;  %v3601_v38 = vld [vmem:[%s4646_s28 + $0x18] sm:$0xe]  ;;  %v3605_v19 = vld [vmem:[%s4646_s28 + $0x48] sm:$0xe]  ;;  %v2871_v61 = vrot.slane %v5264_v26, 5 }
  0xac   : > { %4063 = vmatpush3.bf16.msra.mxu0 %v4410_v44  ;;  %4093 = vmatprep.subr.bf16.mxu1 %v4411_v1  ;;  %v4416_v44 = vld [vmem:[%s4646_s28 + $0x54] sm:$0xff]   ;;  %v5328_v57 = vsel %vm4835_vm5, %v2880_v41, %v2881_v36  ;;  %v3590_v54 = vcombine.low %v2540_v52, %v2550_v58  ;;  %v2597_v36 = vrot.slane %v2595_v7, 5  ;;  %v3609_v40 = vrot.slane %v3601_v38, 9 }
  0xad   : > { %4064 = vmatprep.subr.bf16.mxu0 %v4411_v1  ;;  %3922 = vmatprep.mubr.bf16.mxu1 %v4412_v13  ;;  %v2589_v13 = vshrl.u32 %v5324_v60, 16  ;;  %v2578_v0 = vrot.slane %v2576_v42, 4  ;;  %v2845_v41 = vrot.slane %v2843_v29, 4  ;;  %v3610_v52 = vrot.slane %v3602_v45, 9 }
  0xae   : > { %4050 = vmatprep.mubr.bf16.mxu0 %v3589_v20  ;;  %v3613_v20 = vrot.slane %v3605_v19, 9  ;;  %v2844_v59 = vsel %vm4835_vm5, %v3609_v40, %v2843_v29  ;;  %v2873_v58 = vrot.slane %v2871_v61, 4  ;;  %v2857_v42 = vrot.slane %v5230_v17, 5 }
  0xaf   : > { %4101 = vmatpush3.bf16.msra.mxu1 %v4411_v1  ;;  %v2591_v32 = vrot.slane %v2589_v13, 4  ;;  %v2582_v25 = vor.u32 %v2581_v53, %v2578_v0  ;;  %v2847_v56 = vsel %vm4835_vm5, %v2845_v41, %v2846_v43  ;;  %v2852_v34 = vrot.slane %v2850_v35, 4  ;;  %v3608_v0 = vld [vmem:[%s4646_s28 + $0x6c] sm:$0xe] }
  0xb0   : > { %4065 = vmatpush3.bf16.msra.mxu0 %v4411_v1  ;;  %4094 = vmatprep.subr.bf16.mxu1 %v4414_v18  ;;  %v2567_v1 = vrot.slane %v2565_v15, 4  ;;  %v3633_v16 = vcombine.low %v2844_v59, %v2847_v56  ;;  %v2872_v26 = vsel %vm4835_vm5, %v3613_v20, %v2871_v61  ;;  %v2858_v17 = vsel %vm4835_vm5, %v3611_v5, %v2857_v42 }
  0xb1   : > { %4066 = vmatprep.subr.bf16.mxu0 %v4414_v18  ;;  %v2859_v13 = vrot.slane %v2857_v42, 4  ;;  %v2860_v7 = vrot.slane %v5233_v3, 5  ;;  %v3615_v12 = vrot.slane %v3607_v6, 9  ;;  %v2864_v53 = vrot.slane %v5248_v23, 5 }
  0xb2   : > { %3923 = vmatmul.mubr.bf16.gmra.mrb[8].mxu1 %v4413_v39  ;;  %v2568_v8 = vor.u32 %v2567_v1, %v2563_v4  ;;  %v2564_v39 = vsel %vm4682_vm2, %v2559_v49, %v2563_v4  ;;  %v2853_v4 = vrot.slane %v5212_v50, 5  ;;  %v3614_v1 = vrot.slane %v3606_v63, 9 }
  0xb3   : > { %4102 = vmatpush3.bf16.msra.mxu1 %v4414_v18  ;;  %3926 = vmatprep.mubr.bf16.mxu1 %v4416_v44  ;;  %v2583_v44 = vrot.slane %v2582_v25, 4  ;;  %v2866_v38 = vrot.slane %v2864_v53, 4  ;;  %v2895_v23 = vrot.slane %v5333_v11, 5 }
  0xb4   : > { %4051 = vmatmul.mubr.bf16.gmra.mrb[8].mxu0 %v3590_v54  ;;  %4095 = vmatprep.subr.bf16.mxu1 %v5314_v21  ;;  %v2569_v48 = vrot.slane %v2568_v8, 4  ;;  %v2875_v54 = vsel %vm4835_vm5, %v2873_v58, %v2874_v51  ;;  %v2851_v8 = vsel %vm4835_vm5, %v3610_v52, %v2850_v35  ;;  %v2879_v50 = vsel %vm4835_vm5, %v3614_v1, %v2878_v31 }
  0xb5   : > { %4067 = vmatpush3.bf16.msra.mxu0 %v4414_v18  ;;  %v2592_v18 = vor.u32 %v2591_v32, %v2587_v30  ;;  %v2588_v37 = vsel %vm4682_vm2, %v2583_v44, %v2587_v30  ;;  %v3637_v33 = vcombine.low %v2872_v26, %v2875_v54  ;;  %v3638_v10 = vcombine.low %v2879_v50, %v5328_v57 }
  0xb6   : > { %4068 = vmatprep.subr.bf16.mxu0 %v5314_v21  ;;  %v2574_v28 = vsel %vm4682_vm2, %v2569_v48, %v2573_v14  ;;  %v2854_v49 = vsel %vm4835_vm5, %v2852_v34, %v2853_v4  ;;  %v2888_v31 = vrot.slane %v5309_v47, 5  ;;  %v2861_v57 = vsel %vm4835_vm5, %v2859_v13, %v2860_v7 }
  0xb7   : > { %4103 = vmatpush3.bf16.msra.mxu1 %v5314_v21  ;;  %v3591_v62 = vcombine.low %v2564_v39, %v2574_v28  ;;  %v2593_v15 = vrot.slane %v2592_v18, 4  ;;  %v3634_v3 = vcombine.low %v2851_v8, %v2854_v49  ;;  %v3635_v30 = vcombine.low %v2858_v17, %v2861_v57 }
  0xb8   : > { %4096 = vmatprep.subr.bf16.mxu1 %v4418_v22  ;;  %v2867_v39 = vrot.slane %v5254_v9, 5 }
  0xb9   : > { %4069 = vmatpush3.bf16.msra.mxu0 %v5314_v21  ;;  %4054 = vmatprep.mubr.bf16.mxu0 %v3591_v62  ;;  %v2598_v21 = vsel %vm4682_vm2, %v2593_v15, %v2597_v36  ;;  %v3616_v36 = vrot.slane %v3608_v0, 9 }
  0xba   : > { %3927 = vmatmul.mubr.bf16.gmra.mrb[12].mxu1 %v4417_v24  ;;  %4070 = vmatprep.subr.bf16.mxu0 %v4418_v22  ;;  %v3592_v14 = vcombine.low %v2588_v37, %v2598_v21  ;;  %v2885_v24 = vrot.slane %v5306_v46, 5  ;;  %v2892_v46 = vrot.slane %v5324_v60, 5  ;;  %v2868_v45 = vsel %vm4835_vm5, %v2866_v38, %v2867_v39 }
  0xbb   : > { %4104 = vmatpush3.bf16.msra.mxu1 %v4418_v22  ;;  %4082 = vmatprep.mubr.bf16.mxu1 %v3637_v33 }
  0xbc   : > { %4097 = vmatprep.subr.bf16.mxu1 %v4419_v55  ;;  %4055 = vmatmul.mubr.bf16.gmra.mrb[12].mxu0 %v3592_v14  ;;  %v2886_v29 = vsel %vm4835_vm5, %v3615_v12, %v2885_v24  ;;  %v2887_v48 = vrot.slane %v2885_v24, 4  ;;  %v2893_v40 = vsel %vm4835_vm5, %v3616_v36, %v2892_v46  ;;  %v2894_v41 = vrot.slane %v2892_v46, 4 }
  0xbd   : > { %4071 = vmatpush3.bf16.msra.mxu0 %v4418_v22  ;;  %v3604_v22 = vld [vmem:[%s4646_s28 + $0x3c] sm:$0xe]  ;;  %4074 = vmatprep.mubr.bf16.mxu0 %v3633_v16  ;;  %s4424_s28 = sshll.u32 %s4516_s9, 4  ;;  %s4425_s28 = int_to_ptr.vmem [resolvable:$false] %s4424_s28 }
  0xbe   : > { %4072 = vmatprep.subr.bf16.mxu0 %v4419_v55  ;;  %v3612_v32 = vrot.slane %v3604_v22, 9  ;;  %v2889_v47 = vsel %vm4835_vm5, %v2887_v48, %v2888_v31  ;;  %v2896_v19 = vsel %vm4835_vm5, %v2894_v41, %v2895_v23  ;;  %s4426_s10 = scalar_lea.vmem %s4425_s28, 4096  ;;  %p4427_p2 = scmp.lt.s32.totalorder %s5471_s4, %s4425_s28 }
  0xbf   : > { %4105 = vmatpush3.bf16.msra.mxu1 %v4419_v55  ;;  %v3639_v25 = vcombine.low %v2886_v29, %v2889_v47  ;;  %v3640_v9 = vcombine.low %v2893_v40, %v2896_v19  ;;  %p4428_p4 = scmp.lt.s32.totalorder %s4426_s10, %s4420_s8 }
  0xc0   : > { %v2865_v60 = vsel %vm4835_vm5, %v3612_v32, %v2864_v53 }
  0xc1   : > { %4073 = vmatpush3.bf16.msra.mxu0 %v4419_v55  ;;  %v3636_v28 = vcombine.low %v2865_v60, %v2868_v45  ;;  %p4429_p5 = por %p4428_p4, %p4427_p2 }
  0xc2   : > { %4083 = vmatmul.mubr.bf16.vlgmr.msra.gmra.mrb[16].mxu1 %v3638_v10 }
  0xc3   : > { %4086 = vmatprep.mubr.bf16.mxu1 %v3639_v25  ;;  %p4430_p6 = pnand %p4429_p5, %p4423_p1 }
  0xc4   : > { %4075 = vmatmul.mubr.bf16.vlgmr.msra.gmra.mrb[0].mxu0 %v3634_v3 }
  0xc5   : > { %4078 = vmatprep.mubr.bf16.mxu0 %v3635_v30 }
  0xca   : > { %4087 = vmatmul.mubr.bf16.gmra.mrb[20].mxu1 %v3640_v9 }
  0xcc   : > { %4079 = vmatmul.mubr.bf16.gmra.mrb[4].mxu0 %v3636_v28 }
 0x175   : > { %v3916_v11 = vpop.f32.mrb[0].mxu1 }
 0x176   : > { %v1334_v18 = vpop.f32.mrb[1].mxu1  ;;  %v4106_v29 = vadd.f32 %v3916_v11, %v5423_v27 }
 0x177   : > { %v3917_v43 = vpop.f32.mrb[2].mxu1  ;;  %v4108_v36 = vadd.f32 %v5423_v27, %v1334_v18 }
 0x178   : > { %v1337_v20 = vpop.f32.mrb[3].mxu1  ;;  %v4110_v39 = vadd.f32 %v3917_v43, %v5423_v27 }
 0x179   : > { %v4112_v41 = vadd.f32 %v5423_v27, %v1337_v20 }
 0x17d   : > { %v5412_v62 = vpop.f32.mrb[4].mxu1 }
 0x17e   : > { %v5414_v44 = vpop.f32.mrb[5].mxu1 }
 0x17f   : > { %v5416_v55 = vpop.f32.mrb[6].mxu1 }
 0x180   : > { %v5418_v59 = vpop.f32.mrb[7].mxu1 }
 0x185   : > { %v3924_v61 = vpop.f32.mrb[8].mxu1 }
 0x186   : > { %v4122_v63 = vadd.f32 %v3924_v61, %v5423_v27  ;;  %v1366_v15 = vpop.f32.mrb[9].mxu1 }
 0x187   : > { %v4052_v56 = vpop.f32.mrb[8].mxu0  ;;  %v4125_v51 = vadd.f32 %v5423_v27, %v1366_v15  ;;  %v3925_v52 = vpop.f32.mrb[10].mxu1 }
 0x188   : > { %v4123_v2 = vadd.f32 %v4122_v63, %v4052_v56  ;;  %v2762_v37 = vpop.f32.mrb[9].mxu0  ;;  %v4128_v16 = vadd.f32 %v3925_v52, %v5423_v27  ;;  %v1369_v26 = vpop.f32.mrb[11].mxu1 }
 0x189   : > { %v4126_v58 = vadd.f32 %v4125_v51, %v2762_v37  ;;  %v4053_v21 = vpop.f32.mrb[10].mxu0  ;;  %v4131_v35 = vadd.f32 %v5423_v27, %v1369_v26 }
 0x18a   : > { %v4129_v4 = vadd.f32 %v4128_v16, %v4053_v21  ;;  %v2765_v1 = vpop.f32.mrb[11].mxu0 }
 0x18b   : > { %v4132_v14 = vadd.f32 %v4131_v35, %v2765_v1  ;;  %v4118_v1 = vadd.f32 %v5416_v55, %v5423_v27 }
 0x18d   : > { %v3928_v54 = vpop.f32.mrb[12].mxu1 }
 0x18e   : > { %v4134_v5 = vadd.f32 %v3928_v54, %v5423_v27  ;;  %v1382_v42 = vpop.f32.mrb[13].mxu1 }
 0x18f   : > { %v4137_v6 = vadd.f32 %v5423_v27, %v1382_v42  ;;  %v3929_v33 = vpop.f32.mrb[14].mxu1  ;;  %v4056_v50 = vpop.f32.mrb[12].mxu0 }
 0x190   : > { %v4140_v8 = vadd.f32 %v3929_v33, %v5423_v27  ;;  %v1385_v34 = vpop.f32.mrb[15].mxu1  ;;  %v4135_v17 = vadd.f32 %v4134_v5, %v4056_v50  ;;  %v2778_v13 = vpop.f32.mrb[13].mxu0  ;;  %v4120_v5 = vadd.f32 %v5423_v27, %v5418_v59 }
 0x191   : > { %v4143_v10 = vadd.f32 %v5423_v27, %v1385_v34  ;;  %v4138_v7 = vadd.f32 %v4137_v6, %v2778_v13  ;;  %v4057_v22 = vpop.f32.mrb[14].mxu0 }
 0x192   : > { %v4141_v49 = vadd.f32 %v4140_v8, %v4057_v22  ;;  %v2781_v12 = vpop.f32.mrb[15].mxu0 }
 0x193   : > { %v4144_v24 = vadd.f32 %v4143_v10, %v2781_v12 }
 0x195   : > { %v4084_v31 = vpop.f32.mrb[16].mxu1 }
 0x196   : > { %v4124_v0 = vadd.f32 %v4123_v2, %v4084_v31  ;;  %v3060_v57 = vpop.f32.mrb[17].mxu1  ;;  %v4114_v2 = vadd.f32 %v5412_v62, %v5423_v27 }
 0x197   : > { %v4127_v53 = vadd.f32 %v4126_v58, %v3060_v57  ;;  %v4085_v3 = vpop.f32.mrb[18].mxu1  ;;  %v4076_v46 = vpop.f32.mrb[0].mxu0  ;;  %v4116_v58 = vadd.f32 %v5423_v27, %v5414_v44 }
 0x198   : > { %v3117_v48 = vmax.f32 %v4124_v0, 0.0  ;;  %v4130_v30 = vadd.f32 %v4129_v4, %v4085_v3  ;;  %v3063_v32 = vpop.f32.mrb[19].mxu1  ;;  %v4107_v23 = vadd.f32 %v4106_v29, %v4076_v46  ;;  %v3028_v25 = vpop.f32.mrb[1].mxu0 }
 0x199   : > { %v3115_v47 = vmax.f32 %v4127_v53, 0.0  ;;  %v4133_v38 = vadd.f32 %v4132_v14, %v3063_v32  ;;  %v4109_v19 = vadd.f32 %v4108_v36, %v3028_v25  ;;  %v4077_v60 = vpop.f32.mrb[2].mxu0 }
 0x19a   : > { %3133 = vst [vmem:[%s5439_s21 + $0x50] sm:$0xff] %v3117_v48  ;;  %v3118_v40 = vmax.f32 %v4130_v30, 0.0  ;;  %v3109_v9 = vmax.f32 %v4107_v23, 0.0  ;;  %v4111_v28 = vadd.f32 %v4110_v39, %v4077_v60  ;;  %v3031_v11 = vpop.f32.mrb[3].mxu0 }
 0x19b   : > { %3131 = vst [vmem:[%s5439_s21 + $0x40] sm:$0xff] %v3115_v47  ;;  %v3116_v45 = vmax.f32 %v4133_v38, 0.0  ;;  %v3107_v18 = vmax.f32 %v4109_v19, 0.0  ;;  %v4113_v43 = vadd.f32 %v4112_v41, %v3031_v11 }
 0x19c   : > { %3134 = vst [vmem:[%s5439_s21 + $0x58] sm:$0xff] %v3118_v40  ;;  %3125 = vst [vmem:[%s5439_s21 + $0x10] sm:$0xff] %v3109_v9  ;;  %v3110_v63 = vmax.f32 %v4111_v28, 0.0 }
 0x19d   : > { %3132 = vst [vmem:[%s5439_s21 + $0x48] sm:$0xff] %v3116_v45  ;;  %v4088_v61 = vpop.f32.mrb[20].mxu1  ;;  %3123 = vst [vmem:[%s5439_s21] sm:$0xff] %v3107_v18  ;;  %v3108_v56 = vmax.f32 %v4113_v43, 0.0 }
 0x19e   : > { %v4136_v20 = vadd.f32 %v4135_v17, %v4088_v61  ;;  %v3076_v15 = vpop.f32.mrb[21].mxu1  ;;  %3126 = vst [vmem:[%s5439_s21 + $0x18] sm:$0xff] %v3110_v63 }
 0x19f   : > { %v4139_v51 = vadd.f32 %v4138_v7, %v3076_v15  ;;  %v4089_v52 = vpop.f32.mrb[22].mxu1  ;;  %3124 = vst [vmem:[%s5439_s21 + $0x8] sm:$0xff] %v3108_v56  ;;  %v4080_v21 = vpop.f32.mrb[4].mxu0 }
 0x1a0   : > { %v3121_v37 = vmax.f32 %v4136_v20, 0.0  ;;  %v4142_v16 = vadd.f32 %v4141_v49, %v4089_v52  ;;  %v3079_v26 = vpop.f32.mrb[23].mxu1  ;;  %v4115_v14 = vadd.f32 %v4114_v2, %v4080_v21  ;;  %v3044_v62 = vpop.f32.mrb[5].mxu0 }
 0x1a1   : > { %v3119_v35 = vmax.f32 %v4139_v51, 0.0  ;;  %v4145_v4 = vadd.f32 %v4144_v24, %v3079_v26  ;;  %v4117_v42 = vadd.f32 %v4116_v58, %v3044_v62  ;;  %v4081_v44 = vpop.f32.mrb[6].mxu0 }
 0x1a2   : > { %3137 = vst [vmem:[%s5439_s21 + $0x70] sm:$0xff] %v3121_v37  ;;  %v3122_v54 = vmax.f32 %v4142_v16, 0.0  ;;  %v3113_v55 = vmax.f32 %v4115_v14, 0.0  ;;  %v4119_v33 = vadd.f32 %v4118_v1, %v4081_v44  ;;  %v3047_v8 = vpop.f32.mrb[7].mxu0 }
 0x1a3   : > { %3135 = vst [vmem:[%s5439_s21 + $0x60] sm:$0xff] %v3119_v35  ;;  %v3120_v6 = vmax.f32 %v4145_v4, 0.0  ;;  %v3111_v34 = vmax.f32 %v4117_v42, 0.0  ;;  %v4121_v50 = vadd.f32 %v4120_v5, %v3047_v8 }
 0x1a4   : > { %3138 = vst [vmem:[%s5439_s21 + $0x78] sm:$0xff] %v3122_v54  ;;  %3129 = vst [vmem:[%s5439_s21 + $0x30] sm:$0xff] %v3113_v55  ;;  %v3114_v59 = vmax.f32 %v4119_v33, 0.0 }
 0x1a5   : > { %3136 = vst [vmem:[%s5439_s21 + $0x68] sm:$0xff] %v3120_v6  ;;  %3127 = vst [vmem:[%s5439_s21 + $0x20] sm:$0xff] %v3111_v34  ;;  %v3112_v27 = vmax.f32 %v4121_v50, 0.0 }
 0x1a6   : > { %3130 = vst [vmem:[%s5439_s21 + $0x38] sm:$0xff] %v3114_v59 }
 0x1a7   : > { %3128 = vst [vmem:[%s5439_s21 + $0x28] sm:$0xff] %v3112_v27 }
 0x1a8   : > { %4433 = shalt.err (!%p4430_p6)
}
 0x1a9   : > { %s4434_s11 = scalar_lea.hbm %s5469_s6, 2048  ;;  %s4438_s24 = scalar_lea.hbm %s5533_s3, 8192 }
 0x1aa   : > { %p4435_p7 = scmp.ne.s32.totalorder %s5469_s6, %s4434_s11  ;;  %p4439_p11 = scmp.lt.u32.totalorder %s5469_s6, %s5533_s3 }
 0x1ab   : > { %p4440_p12 = scmp.lt.u32.totalorder %s4438_s24, %s4434_s11  ;;  %p4442_p0 = scmp.lt.u32.totalorder %s4434_s11, %s5469_s6 }
 0x1ac   : > { %p4436_p9 = pnand %p4435_p7, %p4590_p3 }
 0x1ad   : > { %p4441_p13 = por %p4440_p12, %p4439_p11 }
 0x1ae   : > { %p4437_p10 = pneg %p4436_p9 }
 0x1af   : > { %p4443_p1 = por %p4442_p0, %p4441_p13 }
 0x1b1   : > { %p4444_p2 = pnand %p4443_p1, %p4437_p10 }
 0x1b3   : > { %4447 = shalt.err (!%p4444_p2)
}
 0x1b4   : > { %s4517_s16 = smov 128   ;;  %s4518_s29 = smov 8  }
 0x1b5   : > { %4251 = dma.vmem_to_hbm [thread:$0]  (%p4590_p3), %s5471_s4, 2048, %s5469_s6, %s5478_s7, %s4517_s16, %s4517_s16, %s4518_s29  }
 0x1b6 PF: > { %p4257_p4 = scmp.ge.s32.totalorder %s4514_s19, 2  ;;  %s3171_s5 = sand.u32 1, %s4486_s12  }
 0x1b7   : > { %s3172_s8 = scalar_lea.sflag [#allocation3], %s3171_s5 }
 0x1b8   : > { %p4254_p5 = pnand %p4257_p4, %p4599_p8 }
 0x1ba   : > { %4481 = dma.done.wait (!%p4254_p5), %s3172_s8, 2048  }
 0x1bb   : > { %4483 = vsyncadd (!%p4254_p5), %s3172_s8, 4294965248  ;;  %s16_s19 = sadd.s32 1, %s4514_s19   ;;  %s5540_s12 = smov %s4490_s13 }
 0x1bc   : > { %p13_p6 = scmp.ge.s32.totalorder %s16_s19, 6   ;;  %s5541_s13 = smov %s4494_s14 }
 0x1bd   : > { %s5542_s14 = smov %s4608_s30  ;;  %s5543_s15 = smov %s4506_s17 }
 0x1be   : > { %s5544_s16 = smov %s4510_s18  ;;  %s5545_s17 = smov %s5548_s22 }
 0x1bf   : > { %s5546_s18 = smov %s5552_s23  ;;  %15 = sbr.rel (!%p13_p6) target bundleno = 5 (0x5), region = 78 }
 0x1c6   :  { %3177 = vsyncpa [#allocation3], 1 }
 0x1c7   :  { %3179 = vsyncpa [#allocation3 + $0x1], 1 }

</bundles_post_ra>
